<compile_context>
chip_gen: v7x
topology: tpu7x:2x2x1
jax: 0.10.0
libtpu: 0.0.40
codegen_flags: <defaults>
</compile_context>

<pallas_src>
import functools

import jax
import jax.numpy as jnp
from jax.experimental import pallas as pl
from jax.experimental.pallas import tpu as pltpu


def _round_up(n, m):
    return ((n + m - 1) // m) * m


def mlp_kernel(x_ref, w1_ref, b1_ref, w2_ref, b2_ref, w3_ref, b3_ref, o_ref):
    # Activation cast to bf16 happens in-kernel (VPU), matmuls accumulate in f32 on the
    # MXU, bias-add + ReLU stay f32.
    x = x_ref[...].astype(jnp.bfloat16)
    h1 = jnp.dot(x, w1_ref[...], preferred_element_type=jnp.float32)
    h1 = jnp.maximum(h1 + b1_ref[...], 0.0)
    h2 = jnp.dot(h1.astype(jnp.bfloat16), w2_ref[...],
                 preferred_element_type=jnp.float32)
    h2 = jnp.maximum(h2 + b2_ref[...], 0.0)
    y = jnp.dot(h2.astype(jnp.bfloat16), w3_ref[...],
                preferred_element_type=jnp.float32) + b3_ref[...]
    o_ref[...] = y.astype(o_ref.dtype)


def _vmem_capacity_bytes():
    try:
        return int(pltpu.get_tpu_info().vmem_capacity_bytes)
    except Exception:
        return 64 << 20  # conservative: v7x has 64 MiB VMEM per TensorCore


def _vmem_need_bytes(tm, d_in, d_h1, d_h2, d_out, x_isz, o_isz):
    weight_bytes = 2 * (d_in * d_h1 + d_h1 * d_h2 + d_h2 * d_out)      # bf16
    bias_bytes = 4 * (d_h1 + d_h2 + d_out)                             # f32
    x_tile = x_isz * tm * d_in
    o_tile = o_isz * tm * d_out
    inter = 4 * tm * (d_h1 + d_h2 + d_out)                             # f32 h1/h2/y
    # x/out tiles are double-buffered by the pipeline; weights/biases use a constant
    # index_map (fetched once) but still get two pipeline buffers by default.
    return 2 * (x_tile + o_tile) + 2 * (weight_bytes + bias_bytes) + inter


def _choose_tm(B, d_in, d_h1, d_h2, d_out, x_isz, o_isz):
    budget = _vmem_capacity_bytes() - (8 << 20)      # headroom for compiler scratch
    tm = 128
    for cand in (1024, 512, 256, 128):               # 1024 only where VMEM permits
        if _vmem_need_bytes(cand, d_in, d_h1, d_h2, d_out, x_isz, o_isz) <= budget:
            tm = cand
            break
    if 128 < B <= tm:
        # Medium batch: force >=2 grid steps so v7x's two TensorCores both get work.
        tm = max(128, _round_up(-(-B // 2), 8))
    if B <= tm:
        # Small batch: a single block spanning the whole (un-padded) batch.  A block dim
        # equal to the full array dim is always a legal block shape.
        tm = B
    return tm


@functools.partial(jax.jit, static_argnames=("tm",))
def _mlp_pallas(x, w1, b1, w2, b2, w3, b3, *, tm):
    B, d_in = x.shape
    d_h1 = w1.shape[1]
    d_h2 = w2.shape[1]
    d_out = w3.shape[1]
    out_dtype = x.dtype
    x_isz = jnp.dtype(x.dtype).itemsize
    o_isz = jnp.dtype(out_dtype).itemsize

    grid = (pl.cdiv(B, tm),)

    cap = _vmem_capacity_bytes()
    vmem_need = _vmem_need_bytes(tm, d_in, d_h1, d_h2, d_out, x_isz, o_isz)
    vmem_limit = min(vmem_need + (8 << 20), cap - (8 << 20))
    vmem_limit = max(vmem_limit, min(32 << 20, cap - (8 << 20)))

    weight_bytes = 2 * (d_in * d_h1 + d_h1 * d_h2 + d_h2 * d_out)
    bias_bytes = 4 * (d_h1 + d_h2 + d_out)
    flops = 2 * B * (d_in * d_h1 + d_h1 * d_h2 + d_h2 * d_out)
    bytes_accessed = (B * d_in * x_isz + B * d_out * o_isz
                      + weight_bytes + bias_bytes)
    cost = pl.CostEstimate(flops=flops, transcendentals=0,
                           bytes_accessed=bytes_accessed)

    return pl.pallas_call(
        mlp_kernel,
        out_shape=jax.ShapeDtypeStruct((B, d_out), out_dtype),
        grid_spec=pltpu.PrefetchScalarGridSpec(
            num_scalar_prefetch=0,
            grid=grid,
            in_specs=[
                pl.BlockSpec((tm, d_in), lambda i: (i, 0)),      # x tile (f32 in HBM)
                pl.BlockSpec(w1.shape, lambda i: (0, 0)),        # W1 (bf16, resident)
                pl.BlockSpec(b1.shape, lambda i: (0, 0)),        # b1 (f32)
                pl.BlockSpec(w2.shape, lambda i: (0, 0)),        # W2
                pl.BlockSpec(b2.shape, lambda i: (0, 0)),        # b2
                pl.BlockSpec(w3.shape, lambda i: (0, 0)),        # W3
                pl.BlockSpec(b3.shape, lambda i: (0, 0)),        # b3
            ],
            out_specs=pl.BlockSpec((tm, d_out), lambda i: (i, 0)),
        ),
        compiler_params=pltpu.CompilerParams(
            dimension_semantics=("parallel",),
            vmem_limit_bytes=int(vmem_limit),
        ),
        cost_estimate=cost,
    )(x, w1, b1, w2, b2, w3, b3)


def mlp_forward(x, w1, b1, w2, b2, w3, b3, tm=None):
    """Fused 3-layer MLP forward.

    Weights are (in_features, out_features) == transposed nn.Linear.weight and should be
    pre-converted to bf16 once by the caller (done lazily here only as a fallback).
    Biases are (1, out_features) f32.  Output dtype matches x (f32 for module fidelity).
    """
    w1, w2, w3 = (w if w.dtype == jnp.bfloat16 else w.astype(jnp.bfloat16)
                  for w in (w1, w2, w3))
    B, d_in = x.shape
    d_h1, d_h2, d_out = w1.shape[1], w2.shape[1], w3.shape[1]
    if tm is None:
        tm = _choose_tm(B, d_in, d_h1, d_h2, d_out,
                        jnp.dtype(x.dtype).itemsize, jnp.dtype(x.dtype).itemsize)
    return _mlp_pallas(x, w1, b1, w2, b2, w3, b3, tm=tm)


def init_linear(key, fan_in, fan_out, dtype=jnp.float32):
    """Deterministic init mimicking nn.Linear's uniform(-1/sqrt(fan_in), 1/sqrt(fan_in)).

    Weight is stored as (fan_in, fan_out) == PyTorch weight transposed."""
    kw, kb = jax.random.split(key)
    bound = 1.0 / jnp.sqrt(jnp.asarray(fan_in, dtype))
    w = jax.random.uniform(kw, (fan_in, fan_out), dtype, -bound, bound)
    b = jax.random.uniform(kb, (1, fan_out), dtype, -bound, bound)
    return w, b


def mlp_reference(x, w1, b1, w2, b2, w3, b3):
    # Same numerics as the kernel: bf16 matmul inputs, f32 accumulation/epilogue.
    bf = jnp.bfloat16
    h1 = jnp.dot(x.astype(bf), w1.astype(bf),
                 preferred_element_type=jnp.float32) + b1
    h1 = jnp.maximum(h1, 0.0)
    h2 = jnp.dot(h1.astype(bf), w2.astype(bf),
                 preferred_element_type=jnp.float32) + b2
    h2 = jnp.maximum(h2, 0.0)
    return jnp.dot(h2.astype(bf), w3.astype(bf),
                   preferred_element_type=jnp.float32) + b3


if __name__ == "__main__":
    # Small, module-consistent shapes: a "vertical" flattened image of
    # 3 channels x 16 x 16 = 768 features, batch of 2.
    batch = 2
    image_size = 3 * 16 * 16  # 768 (CIFAR-10 would be 3*32*32 = 3072)
    hidden1, hidden2 = 512, 768

    key = jax.random.PRNGKey(0)
    kx, k1, k2, k3 = jax.random.split(key, 4)

    x = jax.random.normal(kx, (batch, image_size), jnp.float32)
    w1, b1 = init_linear(k1, image_size, hidden1)
    w2, b2 = init_linear(k2, hidden1, hidden2)
    w3, b3 = init_linear(k3, hidden2, image_size)

    # One-time bf16 conversion of the weights, outside the jitted hot path
    # (numerics fidelity note: bf16 matmul inputs, f32 accumulation).
    w1_bf, w2_bf, w3_bf = (w.astype(jnp.bfloat16) for w in (w1, w2, w3))

    y = mlp_forward(x, w1_bf, b1, w2_bf, b2, w3_bf, b3)
    y = jax.block_until_ready(y)

    y_ref = mlp_reference(x, w1_bf, b1, w2_bf, b2, w3_bf, b3)
    assert y.shape == (batch, image_size), y.shape
    assert jnp.allclose(y, y_ref, atol=1e-2, rtol=1e-2), "mismatch vs reference"

    print("KERNEL_OK")
</pallas_src>

<mosaic_0001>
module attributes {stable_mosaic.version = 11 : i64} {
  func.func @mlp_kernel(%arg0: i32, %arg1: memref<2x768xf32, #tpu.memory_space<vmem>>, %arg2: memref<768x512xbf16, #tpu.memory_space<vmem>>, %arg3: memref<1x512xf32, #tpu.memory_space<vmem>>, %arg4: memref<512x768xbf16, #tpu.memory_space<vmem>>, %arg5: memref<1x768xf32, #tpu.memory_space<vmem>>, %arg6: memref<768x768xbf16, #tpu.memory_space<vmem>>, %arg7: memref<1x768xf32, #tpu.memory_space<vmem>>, %arg8: memref<2x768xf32, #tpu.memory_space<vmem>>) attributes {dimension_semantics = [#tpu.dimension_semantics<parallel>], iteration_bounds = array<i64: 1>, scalar_prefetch = 0 : i64, scratch_operands = 0 : i64, tpu.core_type = #tpu.core_type<tc>, window_params = [{transform_indices = @transform_0, window_bounds = array<i64: 2, 768>}, {pipeline_mode = #tpu.pipeline_mode<synchronous>, transform_indices = @transform_1, window_bounds = array<i64: 768, 512>}, {pipeline_mode = #tpu.pipeline_mode<synchronous>, transform_indices = @transform_2, window_bounds = array<i64: 1, 512>}, {pipeline_mode = #tpu.pipeline_mode<synchronous>, transform_indices = @transform_3, window_bounds = array<i64: 512, 768>}, {pipeline_mode = #tpu.pipeline_mode<synchronous>, transform_indices = @transform_4, window_bounds = array<i64: 1, 768>}, {pipeline_mode = #tpu.pipeline_mode<synchronous>, transform_indices = @transform_5, window_bounds = array<i64: 768, 768>}, {pipeline_mode = #tpu.pipeline_mode<synchronous>, transform_indices = @transform_6, window_bounds = array<i64: 1, 768>}, {transform_indices = @transform_7, window_bounds = array<i64: 2, 768>}]} {
    %c0 = arith.constant 0 : index
    %c0_0 = arith.constant 0 : index
    %0 = vector.load %arg1[%c0, %c0_0] : memref<2x768xf32, #tpu.memory_space<vmem>>, vector<2x768xf32>
    %1 = arith.truncf %0 : vector<2x768xf32> to vector<2x768xbf16>
    %c0_1 = arith.constant 0 : index
    %c0_2 = arith.constant 0 : index
    %2 = vector.load %arg2[%c0_1, %c0_2] : memref<768x512xbf16, #tpu.memory_space<vmem>>, vector<768x512xbf16>
    %cst = arith.constant dense<0.000000e+00> : vector<2x512xf32>
    %3 = tpu.matmul %1, %2, %cst {dimension_numbers = #tpu.dot_dimension_numbers<[1], [0], [0], [1], [0, 0, 1, 1], [], []>} : vector<2x768xbf16>, vector<768x512xbf16>, vector<2x512xf32> -> vector<2x512xf32>
    %c0_3 = arith.constant 0 : index
    %c0_4 = arith.constant 0 : index
    %4 = vector.load %arg3[%c0_3, %c0_4] : memref<1x512xf32, #tpu.memory_space<vmem>>, vector<1x512xf32>
    %5 = vector.broadcast %4 : vector<1x512xf32> to vector<2x512xf32>
    %6 = arith.addf %3, %5 : vector<2x512xf32>
    %cst_5 = arith.constant 0.000000e+00 : f32
    %7 = vector.broadcast %cst_5 : f32 to vector<2x512xf32>
    %8 = arith.maximumf %6, %7 : vector<2x512xf32>
    %9 = arith.truncf %8 : vector<2x512xf32> to vector<2x512xbf16>
    %c0_6 = arith.constant 0 : index
    %c0_7 = arith.constant 0 : index
    %10 = vector.load %arg4[%c0_6, %c0_7] : memref<512x768xbf16, #tpu.memory_space<vmem>>, vector<512x768xbf16>
    %cst_8 = arith.constant dense<0.000000e+00> : vector<2x768xf32>
    %11 = tpu.matmul %9, %10, %cst_8 {dimension_numbers = #tpu.dot_dimension_numbers<[1], [0], [0], [1], [0, 0, 1, 1], [], []>} : vector<2x512xbf16>, vector<512x768xbf16>, vector<2x768xf32> -> vector<2x768xf32>
    %c0_9 = arith.constant 0 : index
    %c0_10 = arith.constant 0 : index
    %12 = vector.load %arg5[%c0_9, %c0_10] : memref<1x768xf32, #tpu.memory_space<vmem>>, vector<1x768xf32>
    %13 = vector.broadcast %12 : vector<1x768xf32> to vector<2x768xf32>
    %14 = arith.addf %11, %13 : vector<2x768xf32>
    %cst_11 = arith.constant 0.000000e+00 : f32
    %15 = vector.broadcast %cst_11 : f32 to vector<2x768xf32>
    %16 = arith.maximumf %14, %15 : vector<2x768xf32>
    %17 = arith.truncf %16 : vector<2x768xf32> to vector<2x768xbf16>
    %c0_12 = arith.constant 0 : index
    %c0_13 = arith.constant 0 : index
    %18 = vector.load %arg6[%c0_12, %c0_13] : memref<768x768xbf16, #tpu.memory_space<vmem>>, vector<768x768xbf16>
    %cst_14 = arith.constant dense<0.000000e+00> : vector<2x768xf32>
    %19 = tpu.matmul %17, %18, %cst_14 {dimension_numbers = #tpu.dot_dimension_numbers<[1], [0], [0], [1], [0, 0, 1, 1], [], []>} : vector<2x768xbf16>, vector<768x768xbf16>, vector<2x768xf32> -> vector<2x768xf32>
    %c0_15 = arith.constant 0 : index
    %c0_16 = arith.constant 0 : index
    %20 = vector.load %arg7[%c0_15, %c0_16] : memref<1x768xf32, #tpu.memory_space<vmem>>, vector<1x768xf32>
    %21 = vector.broadcast %20 : vector<1x768xf32> to vector<2x768xf32>
    %22 = arith.addf %19, %21 : vector<2x768xf32>
    %c0_17 = arith.constant 0 : index
    %c0_18 = arith.constant 0 : index
    %23 = vector.load %arg8[%c0_17, %c0_18] : memref<2x768xf32, #tpu.memory_space<vmem>>, vector<2x768xf32>
    tpu.vector_store %arg8[%c0_17, %c0_18], %22 {strides = array<i32>} : memref<2x768xf32, #tpu.memory_space<vmem>>, vector<2x768xf32>,
    return
  }
  func.func @transform_0(%arg0: i32) -> (i32, i32) {
    %c0_i32 = arith.constant 0 : i32
    %c0_i32_0 = arith.constant 0 : i32
    return %arg0, %c0_i32 : i32, i32
  }
  func.func @transform_1(%arg0: i32) -> (i32, i32) {
    %c0_i32 = arith.constant 0 : i32
    %c0_i32_0 = arith.constant 0 : i32
    %c0_i32_1 = arith.constant 0 : i32
    return %c0_i32, %c0_i32_0 : i32, i32
  }
  func.func @transform_2(%arg0: i32) -> (i32, i32) {
    %c0_i32 = arith.constant 0 : i32
    %c0_i32_0 = arith.constant 0 : i32
    %c0_i32_1 = arith.constant 0 : i32
    return %c0_i32, %c0_i32_0 : i32, i32
  }
  func.func @transform_3(%arg0: i32) -> (i32, i32) {
    %c0_i32 = arith.constant 0 : i32
    %c0_i32_0 = arith.constant 0 : i32
    %c0_i32_1 = arith.constant 0 : i32
    return %c0_i32, %c0_i32_0 : i32, i32
  }
  func.func @transform_4(%arg0: i32) -> (i32, i32) {
    %c0_i32 = arith.constant 0 : i32
    %c0_i32_0 = arith.constant 0 : i32
    %c0_i32_1 = arith.constant 0 : i32
    return %c0_i32, %c0_i32_0 : i32, i32
  }
  func.func @transform_5(%arg0: i32) -> (i32, i32) {
    %c0_i32 = arith.constant 0 : i32
    %c0_i32_0 = arith.constant 0 : i32
    %c0_i32_1 = arith.constant 0 : i32
    return %c0_i32, %c0_i32_0 : i32, i32
  }
  func.func @transform_6(%arg0: i32) -> (i32, i32) {
    %c0_i32 = arith.constant 0 : i32
    %c0_i32_0 = arith.constant 0 : i32
    %c0_i32_1 = arith.constant 0 : i32
    return %c0_i32, %c0_i32_0 : i32, i32
  }
  func.func @transform_7(%arg0: i32) -> (i32, i32) {
    %c0_i32 = arith.constant 0 : i32
    %c0_i32_0 = arith.constant 0 : i32
    return %arg0, %c0_i32 : i32, i32
  }
}

</mosaic_0001>

<bundles_post_ra>
// kernel: _mlp_pallas.1
= control target key start
LH: loop header
LB: loop body
LE: loop exit
PB: predicated region body
PF: predicated region fallthrough
CT: control target
= control target key end

     0   :  { %12 = vsyncpa [#allocation3], 0  ;;  %s7431_s0 = inlined_call_operand.hbm [shape: f32[2,768], index: 0, kind: input, shape index: {}]   ;;  %s7432_s1 = inlined_call_operand.hbm [shape: bf16[768,512], index: 1, kind: input, shape index: {}]   ;;  %s7433_s2 = inlined_call_operand.hbm [shape: f32[1,512], index: 2, kind: input, shape index: {}]   ;;  %s7434_s3 = inlined_call_operand.hbm [shape: bf16[512,768], index: 3, kind: input, shape index: {}]   ;;  %s7435_s4 = inlined_call_operand.hbm [shape: f32[1,768], index: 4, kind: input, shape index: {}]   ;;  %s7436_s5 = inlined_call_operand.hbm [shape: bf16[768,768], index: 5, kind: input, shape index: {}]   ;;  %s7437_s6 = inlined_call_operand.hbm [shape: f32[1,768], index: 6, kind: input, shape index: {}]   ;;  %s7438_s7 = inlined_call_operand.hbm [shape: f32[2,768], index: 7, kind: output, shape index: {}]  }
   0x1   :  { %13 = vsyncpa [#allocation6], 0 }
   0x2   :  { %14 = vsyncpa [#allocation9], 0 }
   0x3   :  { %15 = vsyncpa [#allocation12], 0 }
   0x4   :  { %16 = vsyncpa [#allocation4], 0  ;;  %s7157_s24 = smov [#allocation5]   ;;  %s6971_s28 = scalar_lea.hbm %s7432_s1, 24576 }
   0x5   :  { %s32_s25 = sshll.u32 %s7157_s24, 4  ;;  %p6972_p0 = scmp.ne.s32.totalorder %s7432_s1, %s6971_s28  ;;  %s33_s25 = int_to_ptr.vmem [resolvable:$true] %s32_s25 }
   0x6   :  { %p6975_p1 = scmp.lt.u32.totalorder %s6971_s28, %s7432_s1 }
   0x8   :  { %p6977_p2 = pnand %p6975_p1, %p6972_p0 }
   0xa   :  { %6980 = shalt.err (!%p6977_p2)
}
   0xb   :  { %s6981_s10 = scalar_lea.vmem %s33_s25, 24576  ;;  %p6986_p4 = scmp.lt.s32.totalorder %s33_s25, %s33_s25 }
   0xc   :  { %p6982_p3 = scmp.ne.s32.totalorder %s33_s25, %s6981_s10  ;;  %p6987_p5 = scmp.lt.s32.totalorder %s6981_s10, %s6981_s10 }
   0xe   :  { %p6988_p6 = por %p6987_p5, %p6986_p4 }
  0x10   :  { %p6989_p7 = pnand %p6988_p6, %p6982_p3 }
  0x12   :  { %6992 = shalt.err (!%p6989_p7)
}
  0x13   :  { %s7158_s11 = smov 256   ;;  %s7159_s12 = smov 16  }
  0x14   :  { %38 = dma.hbm_to_vmem [thread:$0]  %s7432_s1, 24576, %s33_s25, [#allocation6], %s7158_s11, %s7158_s11, %s7159_s12  }
  0x15   :  { %s7160_s15 = smov [#allocation8]   ;;  %s6993_s19 = scalar_lea.hbm %s7434_s3, 24576 }
  0x16   :  { %s54_s16 = sshll.u32 %s7160_s15, 4  ;;  %p6994_p8 = scmp.ne.s32.totalorder %s7434_s3, %s6993_s19  ;;  %s55_s16 = int_to_ptr.vmem [resolvable:$true] %s54_s16 }
  0x17   :  { %p6997_p9 = scmp.lt.u32.totalorder %s6993_s19, %s7434_s3 }
  0x19   :  { %p6999_p10 = pnand %p6997_p9, %p6994_p8 }
  0x1b   :  { %7002 = shalt.err (!%p6999_p10)
}
  0x1c   :  { %s7003_s24 = scalar_lea.vmem %s55_s16, 24576  ;;  %p7008_p12 = scmp.lt.s32.totalorder %s55_s16, %s55_s16 }
  0x1d   :  { %p7004_p11 = scmp.ne.s32.totalorder %s55_s16, %s7003_s24  ;;  %p7009_p13 = scmp.lt.s32.totalorder %s7003_s24, %s7003_s24 }
  0x1f   :  { %p7010_p0 = por %p7009_p13, %p7008_p12 }
  0x21   :  { %p7011_p1 = pnand %p7010_p0, %p7004_p11 }
  0x23   :  { %7014 = shalt.err (!%p7011_p1)
}
  0x24   :  { %s7161_s1 = smov 384   ;;  %s7162_s25 = smov 24  }
  0x25   :  { %60 = dma.hbm_to_vmem [thread:$0]  %s7434_s3, 24576, %s55_s16, [#allocation9], %s7161_s1, %s7161_s1, %s7162_s25  }
  0x26   :  { %s7163_s28 = smov [#allocation11]   ;;  %s7164_s30 = smov [#allocation2]  }
  0x27   :  { %s76_s29 = sshll.u32 %s7163_s28, 4  ;;  %s23_s8 = sshll.u32 %s7164_s30, 4  ;;  %s77_s29 = int_to_ptr.vmem [resolvable:$true] %s76_s29  ;;  %s24_s8 = int_to_ptr.vmem [resolvable:$true] %s23_s8 }
  0x28   :  { %s7015_s11 = scalar_lea.hbm %s7436_s5, 36864 }
  0x29   :  { %p7016_p2 = scmp.ne.s32.totalorder %s7436_s5, %s7015_s11  ;;  %p7019_p3 = scmp.lt.u32.totalorder %s7015_s11, %s7436_s5 }
  0x2b   :  { %p7021_p4 = pnand %p7019_p3, %p7016_p2 }
  0x2d   :  { %7024 = shalt.err (!%p7021_p4)
}
  0x2e   :  { %s7025_s3 = scalar_lea.vmem %s77_s29, 36864  ;;  %p7030_p6 = scmp.lt.s32.totalorder %s77_s29, %s77_s29 }
  0x2f   :  { %p7026_p5 = scmp.ne.s32.totalorder %s77_s29, %s7025_s3  ;;  %p7031_p7 = scmp.lt.s32.totalorder %s7025_s3, %s7025_s3 }
  0x31   :  { %p7032_p8 = por %p7031_p7, %p7030_p6 }
  0x33   :  { %p7033_p9 = pnand %p7032_p8, %p7026_p5 }
  0x35   :  { %7036 = shalt.err (!%p7033_p9)
}
  0x36   :  { %82 = dma.hbm_to_vmem [thread:$0]  %s7436_s5, 36864, %s77_s29, [#allocation12], %s7161_s1, %s7161_s1, %s7162_s25  }
  0x37   :  { %s7037_s20 = scalar_lea.hbm %s7431_s0, 192 }
  0x38   :  { %p7038_p10 = scmp.ne.s32.totalorder %s7431_s0, %s7037_s20  ;;  %p7041_p11 = scmp.lt.u32.totalorder %s7037_s20, %s7431_s0 }
  0x3a   :  { %p7043_p12 = pnand %p7041_p11, %p7038_p10 }
  0x3c   :  { %7046 = shalt.err (!%p7043_p12)
}
  0x3d   :  { %s7047_s26 = scalar_lea.vmem %s24_s8, 192  ;;  %p7052_p0 = scmp.lt.s32.totalorder %s24_s8, %s24_s8 }
  0x3e   :  { %p7048_p13 = scmp.ne.s32.totalorder %s24_s8, %s7047_s26  ;;  %p7053_p1 = scmp.lt.s32.totalorder %s7047_s26, %s7047_s26 }
  0x40   :  { %p7054_p2 = por %p7053_p1, %p7052_p0 }
  0x42   :  { %p7055_p3 = pnand %p7054_p2, %p7048_p13 }
  0x44   :  { %7058 = shalt.err (!%p7055_p3)
}
  0x45   :  { %26 = dma.hbm_to_vmem [thread:$0]  %s7431_s0, 192, %s24_s8, [#allocation3]  }
  0x46   :  { %s7165_s25 = smov [#allocation7]   ;;  %s7166_s28 = smov [#allocation10]  }
  0x47   :  { %s45_s27 = sshll.u32 %s7165_s25, 4  ;;  %s67_s29 = sshll.u32 %s7166_s28, 4  ;;  %s46_s27 = int_to_ptr.vmem [resolvable:$true] %s45_s27  ;;  %s68_s29 = int_to_ptr.vmem [resolvable:$true] %s67_s29 }
  0x48   :  { %s7059_s10 = scalar_lea.hbm %s7433_s2, 64 }
  0x49   :  { %p7060_p4 = scmp.ne.s32.totalorder %s7433_s2, %s7059_s10  ;;  %p7063_p5 = scmp.lt.u32.totalorder %s7059_s10, %s7433_s2 }
  0x4b   :  { %p7065_p6 = pnand %p7063_p5, %p7060_p4 }
  0x4d   :  { %7068 = shalt.err (!%p7065_p6)
}
  0x4e   :  { %s7069_s0 = scalar_lea.vmem %s46_s27, 64  ;;  %p7074_p8 = scmp.lt.s32.totalorder %s46_s27, %s46_s27 }
  0x4f   :  { %p7070_p7 = scmp.ne.s32.totalorder %s46_s27, %s7069_s0  ;;  %p7075_p9 = scmp.lt.s32.totalorder %s7069_s0, %s7069_s0 }
  0x51   :  { %p7076_p10 = por %p7075_p9, %p7074_p8 }
  0x53   :  { %p7077_p11 = pnand %p7076_p10, %p7070_p7 }
  0x55   :  { %7080 = shalt.err (!%p7077_p11)
}
  0x56   :  { %48 = dma.hbm_to_vmem [thread:$0]  %s7433_s2, 64, %s46_s27, [#allocation6]  }
  0x57   :  { %s7081_s17 = scalar_lea.hbm %s7435_s4, 96 }
  0x58   :  { %p7082_p12 = scmp.ne.s32.totalorder %s7435_s4, %s7081_s17  ;;  %p7085_p13 = scmp.lt.u32.totalorder %s7081_s17, %s7435_s4 }
  0x5a   :  { %p7087_p0 = pnand %p7085_p13, %p7082_p12 }
  0x5c   :  { %7090 = shalt.err (!%p7087_p0)
}
  0x5d   :  { %s7091_s22 = scalar_lea.vmem %s68_s29, 96  ;;  %p7096_p2 = scmp.lt.s32.totalorder %s68_s29, %s68_s29 }
  0x5e   :  { %p7092_p1 = scmp.ne.s32.totalorder %s68_s29, %s7091_s22  ;;  %p7097_p3 = scmp.lt.s32.totalorder %s7091_s22, %s7091_s22 }
  0x60   :  { %p7098_p4 = por %p7097_p3, %p7096_p2 }
  0x62   :  { %p7099_p5 = pnand %p7098_p4, %p7092_p1 }
  0x64   :  { %7102 = shalt.err (!%p7099_p5)
}
  0x65   :  { %70 = dma.hbm_to_vmem [thread:$0]  %s7435_s4, 96, %s68_s29, [#allocation9]  }
  0x66   :  { %s7167_s24 = smov [#allocation13]   ;;  %s7103_s25 = scalar_lea.hbm %s7437_s6, 96 }
  0x67   :  { %s89_s26 = sshll.u32 %s7167_s24, 4  ;;  %p7104_p6 = scmp.ne.s32.totalorder %s7437_s6, %s7103_s25  ;;  %s90_s26 = int_to_ptr.vmem [resolvable:$true] %s89_s26 }
  0x68   :  { %p7107_p7 = scmp.lt.u32.totalorder %s7103_s25, %s7437_s6 }
  0x6a   :  { %p7109_p8 = pnand %p7107_p7, %p7104_p6 }
  0x6c   :  { %7112 = shalt.err (!%p7109_p8)
}
  0x6d   :  { %s7113_s10 = scalar_lea.vmem %s90_s26, 96  ;;  %p7118_p10 = scmp.lt.s32.totalorder %s90_s26, %s90_s26 }
  0x6e   :  { %p7114_p9 = scmp.ne.s32.totalorder %s90_s26, %s7113_s10  ;;  %p7119_p11 = scmp.lt.s32.totalorder %s7113_s10, %s7113_s10 }
  0x70   :  { %p7120_p12 = por %p7119_p11, %p7118_p10 }
  0x72   :  { %p7121_p13 = pnand %p7120_p12, %p7114_p9 }
  0x74   :  { %7124 = shalt.err (!%p7121_p13)
}
  0x75   :  { %92 = dma.hbm_to_vmem [thread:$0]  %s7437_s6, 96, %s90_s26, [#allocation12]  }
  0x76   :  { %7147 = dma.done.wait [#allocation3], 192  }
  0x77   :  { %7148 = vsyncadd [#allocation3], 4294967104 }
  0x78   :  { %7149 = dma.done.wait [#allocation6], 24640  }
  0x79   :  { %7150 = vsyncadd [#allocation6], 4294942656 }
  0x7a   :  { %7151 = dma.done.wait [#allocation9], 24672  }
  0x7b   :  { %7152 = vsyncadd [#allocation9], 4294942624 }
  0x7c   :  { %7153 = dma.done.wait [#allocation12], 36960  }
  0x7d   :  { %7154 = vsyncadd [#allocation12], 4294930336  ;;  %v5962_v0 = vld [vmem:[#allocation5 + $0x4] ss:$16 sps:$4 sm:$0xff]   ;;  %v5964_v1 = vld [vmem:[#allocation5 + $0xc] ss:$16 sps:$4 sm:$0xff]   ;;  %v122_v38 = vlaneseq }
  0x7e   :  { %1329 = vmatprep.subr.bf16.mxu0 %v5962_v0  ;;  %v5966_v2 = vld [vmem:[#allocation5] ss:$16 sps:$4 sm:$0xff]   ;;  %v5967_v3 = vld [vmem:[#allocation5 + $0x8] ss:$16 sps:$4 sm:$0xff]   ;;  %1452 = vmatprep.subr.bf16.mxu1 %v5964_v1  ;;  %v5968_v4 = vld [vmem:[#allocation5 + $0x24] ss:$16 sps:$4 sm:$0xff]  }
  0x7f   :  { %1330 = vmatpush1.bf16.msra.mxu0 %v5966_v2  ;;  %1453 = vmatpush1.bf16.msra.mxu1 %v5967_v3  ;;  %v5970_v5 = vld [vmem:[#allocation5 + $0x2c] ss:$16 sps:$4 sm:$0xff]   ;;  %v5972_v6 = vld [vmem:[#allocation5 + $0x20] ss:$16 sps:$4 sm:$0xff]   ;;  %v5973_v7 = vld [vmem:[#allocation5 + $0x28] ss:$16 sps:$4 sm:$0xff]  }
  0x80   :  { %1331 = vmatprep.subr.bf16.mxu0 %v5968_v4  ;;  %1454 = vmatprep.subr.bf16.mxu1 %v5970_v5  ;;  %v5974_v8 = vld [vmem:[#allocation5 + $0x44] ss:$16 sps:$4 sm:$0xff]   ;;  %v5976_v9 = vld [vmem:[#allocation5 + $0x4c] ss:$16 sps:$4 sm:$0xff]   ;;  %v5978_v10 = vld [vmem:[#allocation5 + $0x40] ss:$16 sps:$4 sm:$0xff]  }
  0x81   :  { %v5979_v11 = vld [vmem:[#allocation5 + $0x48] ss:$16 sps:$4 sm:$0xff]   ;;  %v5980_v12 = vld [vmem:[#allocation5 + $0x64] ss:$16 sps:$4 sm:$0xff]   ;;  %v5982_v13 = vld [vmem:[#allocation5 + $0x6c] ss:$16 sps:$4 sm:$0xff]  }
  0x82   :  { %v5984_v14 = vld [vmem:[#allocation5 + $0x60] ss:$16 sps:$4 sm:$0xff]   ;;  %v5985_v15 = vld [vmem:[#allocation5 + $0x68] ss:$16 sps:$4 sm:$0xff]   ;;  %v5986_v16 = vld [vmem:[#allocation5 + $0x84] ss:$16 sps:$4 sm:$0xff]  }
  0x83   :  { %1332 = vmatpush1.bf16.msra.mxu0 %v5972_v6  ;;  %1455 = vmatpush1.bf16.msra.mxu1 %v5973_v7  ;;  %v5988_v17 = vld [vmem:[#allocation5 + $0x8c] ss:$16 sps:$4 sm:$0xff]   ;;  %v5990_v18 = vld [vmem:[#allocation5 + $0x80] ss:$16 sps:$4 sm:$0xff]   ;;  %v5991_v19 = vld [vmem:[#allocation5 + $0x88] ss:$16 sps:$4 sm:$0xff]  }
  0x84   :  { %1333 = vmatprep.subr.bf16.mxu0 %v5974_v8  ;;  %1456 = vmatprep.subr.bf16.mxu1 %v5976_v9  ;;  %v5992_v20 = vld [vmem:[#allocation5 + $0xa4] ss:$16 sps:$4 sm:$0xff]   ;;  %v5994_v21 = vld [vmem:[#allocation5 + $0xac] ss:$16 sps:$4 sm:$0xff]   ;;  %v5996_v22 = vld [vmem:[#allocation5 + $0xa0] ss:$16 sps:$4 sm:$0xff]  }
  0x85   :  { %v5997_v23 = vld [vmem:[#allocation5 + $0xa8] ss:$16 sps:$4 sm:$0xff]   ;;  %v5998_v24 = vld [vmem:[#allocation5 + $0xc4] ss:$16 sps:$4 sm:$0xff]   ;;  %v6000_v25 = vld [vmem:[#allocation5 + $0xcc] ss:$16 sps:$4 sm:$0xff]  }
  0x86   :  { %v6002_v26 = vld [vmem:[#allocation5 + $0xc0] ss:$16 sps:$4 sm:$0xff]   ;;  %v6003_v27 = vld [vmem:[#allocation5 + $0xc8] ss:$16 sps:$4 sm:$0xff]   ;;  %v6004_v28 = vld [vmem:[#allocation5 + $0xe4] ss:$16 sps:$4 sm:$0xff]  }
  0x87   :  { %1334 = vmatpush1.bf16.msra.mxu0 %v5978_v10  ;;  %1457 = vmatpush1.bf16.msra.mxu1 %v5979_v11  ;;  %v6006_v29 = vld [vmem:[#allocation5 + $0xec] ss:$16 sps:$4 sm:$0xff]   ;;  %v6008_v30 = vld [vmem:[#allocation5 + $0xe0] ss:$16 sps:$4 sm:$0xff]   ;;  %v6009_v31 = vld [vmem:[#allocation5 + $0xe8] ss:$16 sps:$4 sm:$0xff]  }
  0x88   :  { %1335 = vmatprep.subr.bf16.mxu0 %v5980_v12  ;;  %1458 = vmatprep.subr.bf16.mxu1 %v5982_v13  ;;  %v6010_v32 = vld [vmem:[#allocation5 + $0x104] ss:$16 sps:$4 sm:$0xff]   ;;  %v6012_v33 = vld [vmem:[#allocation5 + $0x10c] ss:$16 sps:$4 sm:$0xff]   ;;  %v6014_v34 = vld [vmem:[#allocation5 + $0x100] ss:$16 sps:$4 sm:$0xff]  }
  0x89   :  { %v6015_v35 = vld [vmem:[#allocation5 + $0x108] ss:$16 sps:$4 sm:$0xff]   ;;  %v7168_v36 = vmov 1983009808   ;;  %v6016_v39 = vld [vmem:[#allocation5 + $0x124] ss:$16 sps:$4 sm:$0xff]  }
  0x8a   :  { %v120_v37 = vunpack.c.l.s4 %v7168_v36  ;;  %v6018_v40 = vld [vmem:[#allocation5 + $0x12c] ss:$16 sps:$4 sm:$0xff]   ;;  %v6020_v41 = vld [vmem:[#allocation5 + $0x120] ss:$16 sps:$4 sm:$0xff]   ;;  %v7294_v43 = vshrl.u32 %v122_v38, 7  ;;  %v114_v52 = vld [vmem:[#allocation2] sm:$0xff] }
  0x8b   :  { %1336 = vmatpush1.bf16.msra.mxu0 %v5984_v14  ;;  %1459 = vmatpush1.bf16.msra.mxu1 %v5985_v15  ;;  %v6021_v44 = vld [vmem:[#allocation5 + $0x128] ss:$16 sps:$4 sm:$0xff]   ;;  %v6022_v45 = vld [vmem:[#allocation5 + $0x144] ss:$16 sps:$4 sm:$0xff]   ;;  %v6024_v46 = vld [vmem:[#allocation5 + $0x14c] ss:$16 sps:$4 sm:$0xff]   ;;  %v118_v4 = vcombine.high %v114_v52, %v114_v52 }
  0x8c   :  { %1337 = vmatprep.subr.bf16.mxu0 %v5986_v16  ;;  %1460 = vmatprep.subr.bf16.mxu1 %v5988_v17  ;;  %v121_v42 = vunpack.c.0.s8 %v120_v37  ;;  %v6026_v47 = vld [vmem:[#allocation5 + $0x140] ss:$16 sps:$4 sm:$0xff]   ;;  %v6027_v48 = vld [vmem:[#allocation5 + $0x148] ss:$16 sps:$4 sm:$0xff]   ;;  %v6028_v50 = vld [vmem:[#allocation5 + $0x164] ss:$16 sps:$4 sm:$0xff]  }
  0x8d   :  { %v6030_v51 = vld [vmem:[#allocation5 + $0x16c] ss:$16 sps:$4 sm:$0xff]   ;;  %v6032_v53 = vld [vmem:[#allocation5 + $0x160] ss:$16 sps:$4 sm:$0xff]   ;;  %v6033_v55 = vld [vmem:[#allocation5 + $0x168] ss:$16 sps:$4 sm:$0xff]  }
  0x8e   :  { %v7297_v49 = vsub.s32 %v121_v42, %v7294_v43  ;;  %v6034_v56 = vld [vmem:[#allocation5 + $0x184] ss:$16 sps:$4 sm:$0xff]   ;;  %v6036_v57 = vld [vmem:[#allocation5 + $0x18c] ss:$16 sps:$4 sm:$0xff]   ;;  %v6038_v59 = vld [vmem:[#allocation5 + $0x180] ss:$16 sps:$4 sm:$0xff]  }
  0x8f   :  { %1338 = vmatpush1.bf16.msra.mxu0 %v5990_v18  ;;  %1461 = vmatpush1.bf16.msra.mxu1 %v5991_v19  ;;  %v6039_v61 = vld [vmem:[#allocation5 + $0x188] ss:$16 sps:$4 sm:$0xff]   ;;  %v6040_v62 = vld [vmem:[#allocation5 + $0x1a4] ss:$16 sps:$4 sm:$0xff]   ;;  %v6042_v63 = vld [vmem:[#allocation5 + $0x1ac] ss:$16 sps:$4 sm:$0xff]  }
  0x90   :  { %1339 = vmatprep.subr.bf16.mxu0 %v5992_v20  ;;  %1462 = vmatprep.subr.bf16.mxu1 %v5994_v21  ;;  %v125_v54 = vrot.slane %v114_v52, %v7297_v49  ;;  %v6044_v0 = vld [vmem:[#allocation5 + $0x1a0] ss:$16 sps:$4 sm:$0xff]   ;;  %v6045_v1 = vld [vmem:[#allocation5 + $0x1a8] ss:$16 sps:$4 sm:$0xff]   ;;  %v6046_v2 = vld [vmem:[#allocation5 + $0x1c4] ss:$16 sps:$4 sm:$0xff]   ;;  %v7301_v9 = vrot.slane %v118_v4, %v7297_v49 }
  0x91   :  { %v6048_v3 = vld [vmem:[#allocation5 + $0x1cc] ss:$16 sps:$4 sm:$0xff]   ;;  %v6050_v5 = vld [vmem:[#allocation5 + $0x1c0] ss:$16 sps:$4 sm:$0xff]   ;;  %v6051_v6 = vld [vmem:[#allocation5 + $0x1c8] ss:$16 sps:$4 sm:$0xff]  }
  0x92   :  { %v133_v58 = vcombine.high %v125_v54, %v125_v54  ;;  %v6052_v7 = vld [vmem:[#allocation5 + $0x1e4] ss:$16 sps:$4 sm:$0xff]   ;;  %v6054_v8 = vld [vmem:[#allocation5 + $0x1ec] ss:$16 sps:$4 sm:$0xff]   ;;  %v6056_v10 = vld [vmem:[#allocation5 + $0x1e0] ss:$16 sps:$4 sm:$0xff]   ;;  %v134_v14 = vcombine.high %v7301_v9, %v7301_v9  ;;  %v149_v16 = vpack.c.bf16 %v125_v54, %v125_v54 }
  0x93   :  { %1340 = vmatpush1.bf16.msra.mxu0 %v5996_v22  ;;  %1463 = vmatpush1.bf16.msra.mxu1 %v5997_v23  ;;  %v6057_v11 = vld [vmem:[#allocation5 + $0x1e8] ss:$16 sps:$4 sm:$0xff]   ;;  %v6061_v12 = vld [vmem:[#allocation5 + $0x204] ss:$16 sps:$4 sm:$0xff]   ;;  %v6064_v13 = vld [vmem:[#allocation5 + $0x20c] ss:$16 sps:$4 sm:$0xff]  }
  0x94   :  { %1341 = vmatprep.subr.bf16.mxu0 %v5998_v24  ;;  %1464 = vmatprep.subr.bf16.mxu1 %v6000_v25  ;;  %v150_v60 = vpack.c.bf16 %v133_v58, %v133_v58  ;;  %v6059_v15 = vld [vmem:[#allocation5 + $0x200] ss:$16 sps:$4 sm:$0xff]   ;;  %v6062_v17 = vld [vmem:[#allocation5 + $0x208] ss:$16 sps:$4 sm:$0xff]   ;;  %v6067_v18 = vld [vmem:[#allocation5 + $0x224] ss:$16 sps:$4 sm:$0xff]   ;;  %v152_v20 = vpack.c.bf16 %v134_v14, %v134_v14 }
  0x95   :  { %v6070_v19 = vld [vmem:[#allocation5 + $0x22c] ss:$16 sps:$4 sm:$0xff]   ;;  %v6065_v21 = vld [vmem:[#allocation5 + $0x220] ss:$16 sps:$4 sm:$0xff]   ;;  %v6068_v22 = vld [vmem:[#allocation5 + $0x228] ss:$16 sps:$4 sm:$0xff]  }
  0x96   :  { %1361 = vmatprep.mubr.bf16.mxu0 %v150_v60  ;;  %1484 = vmatprep.mubr.bf16.mxu1 %v150_v60  ;;  %v6073_v23 = vld [vmem:[#allocation5 + $0x244] ss:$16 sps:$4 sm:$0xff]   ;;  %v6076_v24 = vld [vmem:[#allocation5 + $0x24c] ss:$16 sps:$4 sm:$0xff]   ;;  %v6071_v25 = vld [vmem:[#allocation5 + $0x240] ss:$16 sps:$4 sm:$0xff]  }
  0x97   :  { %1342 = vmatpush1.bf16.msra.mxu0 %v6002_v26  ;;  %1465 = vmatpush1.bf16.msra.mxu1 %v6003_v27  ;;  %v6074_v26 = vld [vmem:[#allocation5 + $0x248] ss:$16 sps:$4 sm:$0xff]   ;;  %v6079_v27 = vld [vmem:[#allocation5 + $0x264] ss:$16 sps:$4 sm:$0xff]   ;;  %v6094_v36 = vld [vmem:[#allocation5 + $0x2ac] ss:$16 sps:$4 sm:$0xff]  }
  0x98   :  { %1343 = vmatprep.subr.bf16.mxu0 %v6004_v28  ;;  %1466 = vmatprep.subr.bf16.mxu1 %v6006_v29  ;;  %v6082_v28 = vld [vmem:[#allocation5 + $0x26c] ss:$16 sps:$4 sm:$0xff]   ;;  %v6077_v29 = vld [vmem:[#allocation5 + $0x260] ss:$16 sps:$4 sm:$0xff]   ;;  %v6092_v38 = vld [vmem:[#allocation5 + $0x2a8] ss:$16 sps:$4 sm:$0xff]  }
  0x99   :  { %v6089_v37 = vld [vmem:[#allocation5 + $0x2a0] ss:$16 sps:$4 sm:$0xff]   ;;  %v6098_v42 = vld [vmem:[#allocation5 + $0x2c8] ss:$16 sps:$4 sm:$0xff]   ;;  %v6118_v54 = vld [vmem:[#allocation5 + $0x32c] ss:$16 sps:$4 sm:$0xff]  }
  0x9a   :  { %v6110_v52 = vld [vmem:[#allocation5 + $0x308] ss:$16 sps:$4 sm:$0xff]   ;;  %v6124_v58 = vld [vmem:[#allocation5 + $0x34c] ss:$16 sps:$4 sm:$0xff]   ;;  %v6151_v14 = vld [vmem:[#allocation5 + $0x3e4] ss:$16 sps:$4 sm:$0xff]  }
  0x9b   :  { %1344 = vmatpush1.bf16.msra.mxu0 %v6008_v30  ;;  %1467 = vmatpush1.bf16.msra.mxu1 %v6009_v31  ;;  %v6080_v30 = vld [vmem:[#allocation5 + $0x268] ss:$16 sps:$4 sm:$0xff]   ;;  %v6085_v31 = vld [vmem:[#allocation5 + $0x284] ss:$16 sps:$4 sm:$0xff]   ;;  %s7169_s6 = smov [#allocation14]  }
  0x9c   :  { %1345 = vmatprep.subr.bf16.mxu0 %v6010_v32  ;;  %1468 = vmatprep.subr.bf16.mxu1 %v6012_v33  ;;  %v6088_v32 = vld [vmem:[#allocation5 + $0x28c] ss:$16 sps:$4 sm:$0xff]   ;;  %v6083_v33 = vld [vmem:[#allocation5 + $0x280] ss:$16 sps:$4 sm:$0xff]   ;;  %v6122_v60 = vld [vmem:[#allocation5 + $0x348] ss:$16 sps:$4 sm:$0xff]  }
  0x9d   :  { %v6134_v4 = vld [vmem:[#allocation5 + $0x388] ss:$16 sps:$4 sm:$0xff]   ;;  %s5195_s11 = sshll.u32 %s7169_s6, 4  ;;  %s5196_s11 = int_to_ptr.vmem [resolvable:$true] %s5195_s11 }
  0x9e   :  { %s7125_s12 = scalar_lea.vmem %s5196_s11, 192  ;;  %p7130_p1 = scmp.lt.s32.totalorder %s5196_s11, %s5196_s11 }
  0x9f   :  { %1346 = vmatpush1.bf16.msra.mxu0 %v6014_v34  ;;  %1469 = vmatpush1.bf16.msra.mxu1 %v6015_v35  ;;  %v6086_v34 = vld [vmem:[#allocation5 + $0x288] ss:$16 sps:$4 sm:$0xff]   ;;  %v6091_v35 = vld [vmem:[#allocation5 + $0x2a4] ss:$16 sps:$4 sm:$0xff]   ;;  %p7126_p0 = scmp.ne.s32.totalorder %s5196_s11, %s7125_s12  ;;  %p7131_p2 = scmp.lt.s32.totalorder %s7125_s12, %s7125_s12 }
  0xa0   :  { %1347 = vmatprep.subr.bf16.mxu0 %v6016_v39  ;;  %1470 = vmatprep.subr.bf16.mxu1 %v6018_v40  ;;  %v6097_v39 = vld [vmem:[#allocation5 + $0x2c4] ss:$16 sps:$4 sm:$0xff]   ;;  %v6100_v40 = vld [vmem:[#allocation5 + $0x2cc] ss:$16 sps:$4 sm:$0xff]  }
  0xa1   :  { %p7132_p3 = por %p7131_p2, %p7130_p1 }
  0xa3   :  { %1348 = vmatpush1.bf16.msra.mxu0 %v6020_v41  ;;  %1471 = vmatpush1.bf16.msra.mxu1 %v6021_v44  ;;  %v6095_v41 = vld [vmem:[#allocation5 + $0x2c0] ss:$16 sps:$4 sm:$0xff]   ;;  %v6103_v44 = vld [vmem:[#allocation5 + $0x2e4] ss:$16 sps:$4 sm:$0xff]   ;;  %p7133_p4 = pnand %p7132_p3, %p7126_p0 }
  0xa4   :  { %1349 = vmatprep.subr.bf16.mxu0 %v6022_v45  ;;  %1472 = vmatprep.subr.bf16.mxu1 %v6024_v46  ;;  %v6106_v45 = vld [vmem:[#allocation5 + $0x2ec] ss:$16 sps:$4 sm:$0xff]   ;;  %v6101_v46 = vld [vmem:[#allocation5 + $0x2e0] ss:$16 sps:$4 sm:$0xff]  }
  0xa7   :  { %1350 = vmatpush1.bf16.msra.mxu0 %v6026_v47  ;;  %1473 = vmatpush1.bf16.msra.mxu1 %v6027_v48  ;;  %v6104_v47 = vld [vmem:[#allocation5 + $0x2e8] ss:$16 sps:$4 sm:$0xff]   ;;  %v6109_v48 = vld [vmem:[#allocation5 + $0x304] ss:$16 sps:$4 sm:$0xff]  }
  0xa8   :  { %1351 = vmatprep.subr.bf16.mxu0 %v6028_v50  ;;  %1474 = vmatprep.subr.bf16.mxu1 %v6030_v51  ;;  %v6112_v50 = vld [vmem:[#allocation5 + $0x30c] ss:$16 sps:$4 sm:$0xff]   ;;  %v6107_v51 = vld [vmem:[#allocation5 + $0x300] ss:$16 sps:$4 sm:$0xff]  }
  0xab   :  { %1352 = vmatpush1.bf16.msra.mxu0 %v6032_v53  ;;  %1475 = vmatpush1.bf16.msra.mxu1 %v6033_v55  ;;  %v6115_v53 = vld [vmem:[#allocation5 + $0x324] ss:$16 sps:$4 sm:$0xff]   ;;  %v6113_v55 = vld [vmem:[#allocation5 + $0x320] ss:$16 sps:$4 sm:$0xff]  }
  0xac   :  { %1353 = vmatprep.subr.bf16.mxu0 %v6034_v56  ;;  %1476 = vmatprep.subr.bf16.mxu1 %v6036_v57  ;;  %v6116_v56 = vld [vmem:[#allocation5 + $0x328] ss:$16 sps:$4 sm:$0xff]   ;;  %v6121_v57 = vld [vmem:[#allocation5 + $0x344] ss:$16 sps:$4 sm:$0xff]  }
  0xaf   :  { %1354 = vmatpush1.bf16.msra.mxu0 %v6038_v59  ;;  %1477 = vmatpush1.bf16.msra.mxu1 %v6039_v61  ;;  %v6119_v59 = vld [vmem:[#allocation5 + $0x340] ss:$16 sps:$4 sm:$0xff]   ;;  %v6127_v61 = vld [vmem:[#allocation5 + $0x364] ss:$16 sps:$4 sm:$0xff]  }
  0xb0   :  { %1355 = vmatprep.subr.bf16.mxu0 %v6040_v62  ;;  %1478 = vmatprep.subr.bf16.mxu1 %v6042_v63  ;;  %v6130_v62 = vld [vmem:[#allocation5 + $0x36c] ss:$16 sps:$4 sm:$0xff]   ;;  %v6125_v63 = vld [vmem:[#allocation5 + $0x360] ss:$16 sps:$4 sm:$0xff]  }
  0xb3   :  { %1356 = vmatpush1.bf16.msra.mxu0 %v6044_v0  ;;  %1479 = vmatpush1.bf16.msra.mxu1 %v6045_v1  ;;  %v6128_v0 = vld [vmem:[#allocation5 + $0x368] ss:$16 sps:$4 sm:$0xff]   ;;  %v6133_v1 = vld [vmem:[#allocation5 + $0x384] ss:$16 sps:$4 sm:$0xff]  }
  0xb4   :  { %1357 = vmatprep.subr.bf16.mxu0 %v6046_v2  ;;  %1480 = vmatprep.subr.bf16.mxu1 %v6048_v3  ;;  %v6136_v2 = vld [vmem:[#allocation5 + $0x38c] ss:$16 sps:$4 sm:$0xff]   ;;  %v6131_v3 = vld [vmem:[#allocation5 + $0x380] ss:$16 sps:$4 sm:$0xff]  }
  0xb7   :  { %1358 = vmatpush1.bf16.msra.mxu0 %v6050_v5  ;;  %1481 = vmatpush1.bf16.msra.mxu1 %v6051_v6  ;;  %v6139_v5 = vld [vmem:[#allocation5 + $0x3a4] ss:$16 sps:$4 sm:$0xff]   ;;  %v6142_v6 = vld [vmem:[#allocation5 + $0x3ac] ss:$16 sps:$4 sm:$0xff]  }
  0xb8   :  { %1359 = vmatprep.subr.bf16.mxu0 %v6052_v7  ;;  %1482 = vmatprep.subr.bf16.mxu1 %v6054_v8  ;;  %v6137_v7 = vld [vmem:[#allocation5 + $0x3a0] ss:$16 sps:$4 sm:$0xff]   ;;  %v6140_v8 = vld [vmem:[#allocation5 + $0x3a8] ss:$16 sps:$4 sm:$0xff]  }
  0xbb   :  { %1360 = vmatpush1.bf16.msra.mxu0 %v6056_v10  ;;  %1483 = vmatpush1.bf16.msra.mxu1 %v6057_v11  ;;  %v6145_v10 = vld [vmem:[#allocation5 + $0x3c4] ss:$16 sps:$4 sm:$0xff]   ;;  %v6148_v11 = vld [vmem:[#allocation5 + $0x3cc] ss:$16 sps:$4 sm:$0xff]  }
  0xbc   :  { %1370 = vmatprep.subr.bf16.mxu0 %v6061_v12  ;;  %1493 = vmatprep.subr.bf16.mxu1 %v6064_v13  ;;  %v6143_v12 = vld [vmem:[#allocation5 + $0x3c0] ss:$16 sps:$4 sm:$0xff]   ;;  %v6146_v13 = vld [vmem:[#allocation5 + $0x3c8] ss:$16 sps:$4 sm:$0xff]  }
  0xbe   :  { %1362 = vmatmul.mubr.bf16.vlgmr.msra.gmra.mrb[0].mxu0 %v149_v16  ;;  %1485 = vmatmul.mubr.bf16.vlgmr.msra.gmra.mrb[0].mxu1 %v149_v16  ;;  %v6149_v16 = vld [vmem:[#allocation5 + $0x3e0] ss:$16 sps:$4 sm:$0xff]  }
  0xbf   :  { %1371 = vmatpush1.bf16.msra.mxu0 %v6059_v15  ;;  %1494 = vmatpush1.bf16.msra.mxu1 %v6062_v17  ;;  %v6154_v15 = vld [vmem:[#allocation5 + $0x3ec] ss:$16 sps:$4 sm:$0xff]   ;;  %v6152_v17 = vld [vmem:[#allocation5 + $0x3e8] ss:$16 sps:$4 sm:$0xff]  }
  0xc0   :  { %1372 = vmatprep.subr.bf16.mxu0 %v6067_v18  ;;  %1495 = vmatprep.subr.bf16.mxu1 %v6070_v19  ;;  %v6157_v18 = vld [vmem:[#allocation5 + $0x404] ss:$16 sps:$4 sm:$0xff]   ;;  %v6160_v19 = vld [vmem:[#allocation5 + $0x40c] ss:$16 sps:$4 sm:$0xff]  }
  0xc1   :  { %1402 = vmatprep.mubr.bf16.mxu0 %v152_v20  ;;  %1525 = vmatprep.mubr.bf16.mxu1 %v152_v20  ;;  %v6155_v20 = vld [vmem:[#allocation5 + $0x400] ss:$16 sps:$4 sm:$0xff]  }
  0xc3   :  { %1373 = vmatpush1.bf16.msra.mxu0 %v6065_v21  ;;  %1496 = vmatpush1.bf16.msra.mxu1 %v6068_v22  ;;  %v6158_v21 = vld [vmem:[#allocation5 + $0x408] ss:$16 sps:$4 sm:$0xff]   ;;  %v151_v22 = vpack.c.bf16 %v7301_v9, %v7301_v9  ;;  %v6172_v9 = vld [vmem:[#allocation5 + $0x44c] ss:$16 sps:$4 sm:$0xff]  }
  0xc4   :  { %1374 = vmatprep.subr.bf16.mxu0 %v6073_v23  ;;  %1497 = vmatprep.subr.bf16.mxu1 %v6076_v24  ;;  %v6163_v23 = vld [vmem:[#allocation5 + $0x424] ss:$16 sps:$4 sm:$0xff]   ;;  %v7307_v24 = vld.sshfl [vmem:[#allocation2 + $0x8] sm:$0x33 pattern:$0x76325410] }
  0xc7   :  { %1375 = vmatpush1.bf16.msra.mxu0 %v6071_v25  ;;  %1498 = vmatpush1.bf16.msra.mxu1 %v6074_v26  ;;  %v6166_v25 = vld [vmem:[#allocation5 + $0x42c] ss:$16 sps:$4 sm:$0xff]   ;;  %v142_v26 = vcombine.high %v7307_v24, %v7307_v24 }
  0xc8   :  { %1376 = vmatprep.subr.bf16.mxu0 %v6079_v27  ;;  %1499 = vmatprep.subr.bf16.mxu1 %v6082_v28  ;;  %v6161_v27 = vld [vmem:[#allocation5 + $0x420] ss:$16 sps:$4 sm:$0xff]  }
  0xc9   :  { %v154_v28 = vpack.c.bf16 %v142_v26, %v142_v26  ;;  %v6256_v26 = vld [vmem:[#allocation8 + $0xc] ss:$24 sps:$4 sm:$0xff]  }
  0xcb   :  { %1377 = vmatpush1.bf16.msra.mxu0 %v6077_v29  ;;  %1500 = vmatpush1.bf16.msra.mxu1 %v6080_v30  ;;  %v6164_v29 = vld [vmem:[#allocation5 + $0x428] ss:$16 sps:$4 sm:$0xff]   ;;  %v6169_v30 = vld [vmem:[#allocation5 + $0x444] ss:$16 sps:$4 sm:$0xff]  }
  0xcc   :  { %1378 = vmatprep.subr.bf16.mxu0 %v6085_v31  ;;  %1501 = vmatprep.subr.bf16.mxu1 %v6088_v32  ;;  %v6167_v31 = vld [vmem:[#allocation5 + $0x440] ss:$16 sps:$4 sm:$0xff]   ;;  %v6170_v32 = vld [vmem:[#allocation5 + $0x448] ss:$16 sps:$4 sm:$0xff]  }
  0xcf   :  { %1379 = vmatpush1.bf16.msra.mxu0 %v6083_v33  ;;  %1502 = vmatpush1.bf16.msra.mxu1 %v6086_v34  ;;  %v6175_v33 = vld [vmem:[#allocation5 + $0x464] ss:$16 sps:$4 sm:$0xff]   ;;  %v6178_v34 = vld [vmem:[#allocation5 + $0x46c] ss:$16 sps:$4 sm:$0xff]  }
  0xd0   :  { %1380 = vmatprep.subr.bf16.mxu0 %v6091_v35  ;;  %1503 = vmatprep.subr.bf16.mxu1 %v6094_v36  ;;  %v6173_v35 = vld [vmem:[#allocation5 + $0x460] ss:$16 sps:$4 sm:$0xff]   ;;  %v6176_v36 = vld [vmem:[#allocation5 + $0x468] ss:$16 sps:$4 sm:$0xff]  }
  0xd3   :  { %1381 = vmatpush1.bf16.msra.mxu0 %v6089_v37  ;;  %1504 = vmatpush1.bf16.msra.mxu1 %v6092_v38  ;;  %v6181_v37 = vld [vmem:[#allocation5 + $0x484] ss:$16 sps:$4 sm:$0xff]   ;;  %v6184_v38 = vld [vmem:[#allocation5 + $0x48c] ss:$16 sps:$4 sm:$0xff]  }
  0xd4   :  { %1382 = vmatprep.subr.bf16.mxu0 %v6097_v39  ;;  %1505 = vmatprep.subr.bf16.mxu1 %v6100_v40  ;;  %v6179_v39 = vld [vmem:[#allocation5 + $0x480] ss:$16 sps:$4 sm:$0xff]   ;;  %v6182_v40 = vld [vmem:[#allocation5 + $0x488] ss:$16 sps:$4 sm:$0xff]  }
  0xd7   :  { %1383 = vmatpush1.bf16.msra.mxu0 %v6095_v41  ;;  %1506 = vmatpush1.bf16.msra.mxu1 %v6098_v42  ;;  %v6187_v41 = vld [vmem:[#allocation5 + $0x4a4] ss:$16 sps:$4 sm:$0xff]   ;;  %v6190_v42 = vld [vmem:[#allocation5 + $0x4ac] ss:$16 sps:$4 sm:$0xff]  }
  0xd8   :  { %1384 = vmatprep.subr.bf16.mxu0 %v6103_v44  ;;  %1507 = vmatprep.subr.bf16.mxu1 %v6106_v45  ;;  %v6185_v44 = vld [vmem:[#allocation5 + $0x4a0] ss:$16 sps:$4 sm:$0xff]   ;;  %v6188_v45 = vld [vmem:[#allocation5 + $0x4a8] ss:$16 sps:$4 sm:$0xff]  }
  0xdb   :  { %1385 = vmatpush1.bf16.msra.mxu0 %v6101_v46  ;;  %1508 = vmatpush1.bf16.msra.mxu1 %v6104_v47  ;;  %v6193_v46 = vld [vmem:[#allocation5 + $0x4c4] ss:$16 sps:$4 sm:$0xff]   ;;  %v6196_v47 = vld [vmem:[#allocation5 + $0x4cc] ss:$16 sps:$4 sm:$0xff]  }
  0xdc   :  { %1386 = vmatprep.subr.bf16.mxu0 %v6109_v48  ;;  %1509 = vmatprep.subr.bf16.mxu1 %v6112_v50  ;;  %v6191_v48 = vld [vmem:[#allocation5 + $0x4c0] ss:$16 sps:$4 sm:$0xff]   ;;  %v6194_v50 = vld [vmem:[#allocation5 + $0x4c8] ss:$16 sps:$4 sm:$0xff]  }
  0xdf   :  { %1387 = vmatpush1.bf16.msra.mxu0 %v6107_v51  ;;  %1510 = vmatpush1.bf16.msra.mxu1 %v6110_v52  ;;  %v6199_v51 = vld [vmem:[#allocation5 + $0x4e4] ss:$16 sps:$4 sm:$0xff]   ;;  %v6202_v52 = vld [vmem:[#allocation5 + $0x4ec] ss:$16 sps:$4 sm:$0xff]  }
  0xe0   :  { %1388 = vmatprep.subr.bf16.mxu0 %v6115_v53  ;;  %1511 = vmatprep.subr.bf16.mxu1 %v6118_v54  ;;  %v6197_v53 = vld [vmem:[#allocation5 + $0x4e0] ss:$16 sps:$4 sm:$0xff]   ;;  %v6200_v54 = vld [vmem:[#allocation5 + $0x4e8] ss:$16 sps:$4 sm:$0xff]  }
  0xe3   :  { %1389 = vmatpush1.bf16.msra.mxu0 %v6113_v55  ;;  %1512 = vmatpush1.bf16.msra.mxu1 %v6116_v56  ;;  %v6205_v55 = vld [vmem:[#allocation5 + $0x504] ss:$16 sps:$4 sm:$0xff]   ;;  %v6208_v56 = vld [vmem:[#allocation5 + $0x50c] ss:$16 sps:$4 sm:$0xff]  }
  0xe4   :  { %1390 = vmatprep.subr.bf16.mxu0 %v6121_v57  ;;  %1513 = vmatprep.subr.bf16.mxu1 %v6124_v58  ;;  %v6203_v57 = vld [vmem:[#allocation5 + $0x500] ss:$16 sps:$4 sm:$0xff]   ;;  %v6206_v58 = vld [vmem:[#allocation5 + $0x508] ss:$16 sps:$4 sm:$0xff]  }
  0xe7   :  { %1391 = vmatpush1.bf16.msra.mxu0 %v6119_v59  ;;  %1514 = vmatpush1.bf16.msra.mxu1 %v6122_v60  ;;  %v6211_v59 = vld [vmem:[#allocation5 + $0x524] ss:$16 sps:$4 sm:$0xff]   ;;  %v6214_v60 = vld [vmem:[#allocation5 + $0x52c] ss:$16 sps:$4 sm:$0xff]  }
  0xe8   :  { %1392 = vmatprep.subr.bf16.mxu0 %v6127_v61  ;;  %1515 = vmatprep.subr.bf16.mxu1 %v6130_v62  ;;  %v6209_v61 = vld [vmem:[#allocation5 + $0x520] ss:$16 sps:$4 sm:$0xff]   ;;  %v6212_v62 = vld [vmem:[#allocation5 + $0x528] ss:$16 sps:$4 sm:$0xff]  }
  0xeb   :  { %1393 = vmatpush1.bf16.msra.mxu0 %v6125_v63  ;;  %1516 = vmatpush1.bf16.msra.mxu1 %v6128_v0  ;;  %v6217_v63 = vld [vmem:[#allocation5 + $0x544] ss:$16 sps:$4 sm:$0xff]   ;;  %v6220_v0 = vld [vmem:[#allocation5 + $0x54c] ss:$16 sps:$4 sm:$0xff]  }
  0xec   :  { %1394 = vmatprep.subr.bf16.mxu0 %v6133_v1  ;;  %1517 = vmatprep.subr.bf16.mxu1 %v6136_v2  ;;  %v6215_v1 = vld [vmem:[#allocation5 + $0x540] ss:$16 sps:$4 sm:$0xff]   ;;  %v6218_v2 = vld [vmem:[#allocation5 + $0x548] ss:$16 sps:$4 sm:$0xff]  }
  0xef   :  { %1395 = vmatpush1.bf16.msra.mxu0 %v6131_v3  ;;  %1518 = vmatpush1.bf16.msra.mxu1 %v6134_v4  ;;  %v6223_v3 = vld [vmem:[#allocation5 + $0x564] ss:$16 sps:$4 sm:$0xff]   ;;  %v6226_v4 = vld [vmem:[#allocation5 + $0x56c] ss:$16 sps:$4 sm:$0xff]  }
  0xf0   :  { %1396 = vmatprep.subr.bf16.mxu0 %v6139_v5  ;;  %1519 = vmatprep.subr.bf16.mxu1 %v6142_v6  ;;  %v6221_v5 = vld [vmem:[#allocation5 + $0x560] ss:$16 sps:$4 sm:$0xff]   ;;  %v6224_v6 = vld [vmem:[#allocation5 + $0x568] ss:$16 sps:$4 sm:$0xff]  }
  0xf3   :  { %1397 = vmatpush1.bf16.msra.mxu0 %v6137_v7  ;;  %1520 = vmatpush1.bf16.msra.mxu1 %v6140_v8  ;;  %v6229_v7 = vld [vmem:[#allocation5 + $0x584] ss:$16 sps:$4 sm:$0xff]   ;;  %v6232_v8 = vld [vmem:[#allocation5 + $0x58c] ss:$16 sps:$4 sm:$0xff]  }
  0xf4   :  { %1398 = vmatprep.subr.bf16.mxu0 %v6145_v10  ;;  %1521 = vmatprep.subr.bf16.mxu1 %v6148_v11  ;;  %v6227_v10 = vld [vmem:[#allocation5 + $0x580] ss:$16 sps:$4 sm:$0xff]   ;;  %v6230_v11 = vld [vmem:[#allocation5 + $0x588] ss:$16 sps:$4 sm:$0xff]  }
  0xf7   :  { %1399 = vmatpush1.bf16.msra.mxu0 %v6143_v12  ;;  %1522 = vmatpush1.bf16.msra.mxu1 %v6146_v13  ;;  %v6235_v12 = vld [vmem:[#allocation5 + $0x5a4] ss:$16 sps:$4 sm:$0xff]   ;;  %v6238_v13 = vld [vmem:[#allocation5 + $0x5ac] ss:$16 sps:$4 sm:$0xff]  }
  0xf8   :  { %1400 = vmatprep.subr.bf16.mxu0 %v6151_v14  ;;  %1523 = vmatprep.subr.bf16.mxu1 %v6154_v15  ;;  %v6233_v14 = vld [vmem:[#allocation5 + $0x5a0] ss:$16 sps:$4 sm:$0xff]   ;;  %v6236_v15 = vld [vmem:[#allocation5 + $0x5a8] ss:$16 sps:$4 sm:$0xff]  }
  0xfb   :  { %1401 = vmatpush1.bf16.msra.mxu0 %v6149_v16  ;;  %1524 = vmatpush1.bf16.msra.mxu1 %v6152_v17  ;;  %v6241_v16 = vld [vmem:[#allocation5 + $0x5c4] ss:$16 sps:$4 sm:$0xff]   ;;  %v6244_v17 = vld [vmem:[#allocation5 + $0x5cc] ss:$16 sps:$4 sm:$0xff]  }
  0xfc   :  { %1411 = vmatprep.subr.bf16.mxu0 %v6157_v18  ;;  %1534 = vmatprep.subr.bf16.mxu1 %v6160_v19  ;;  %v6239_v18 = vld [vmem:[#allocation5 + $0x5c0] ss:$16 sps:$4 sm:$0xff]   ;;  %v6242_v19 = vld [vmem:[#allocation5 + $0x5c8] ss:$16 sps:$4 sm:$0xff]  }
  0xfe   :  { %1403 = vmatmul.mubr.bf16.vlgmr.msra.gmra.mrb[0].mxu0 %v151_v22  ;;  %1526 = vmatmul.mubr.bf16.vlgmr.msra.gmra.mrb[0].mxu1 %v151_v22  ;;  %v6245_v22 = vld [vmem:[#allocation5 + $0x5e0] ss:$16 sps:$4 sm:$0xff]  }
  0xff   :  { %1412 = vmatpush1.bf16.msra.mxu0 %v6155_v20  ;;  %1535 = vmatpush1.bf16.msra.mxu1 %v6158_v21  ;;  %v6247_v20 = vld [vmem:[#allocation5 + $0x5e4] ss:$16 sps:$4 sm:$0xff]   ;;  %v6250_v21 = vld [vmem:[#allocation5 + $0x5ec] ss:$16 sps:$4 sm:$0xff]  }
 0x100   :  { %1413 = vmatprep.subr.bf16.mxu0 %v6163_v23  ;;  %1536 = vmatprep.subr.bf16.mxu1 %v6166_v25  ;;  %v6248_v23 = vld [vmem:[#allocation5 + $0x5e8] ss:$16 sps:$4 sm:$0xff]  }
 0x101   :  { %1443 = vmatprep.mubr.bf16.mxu0 %v154_v28  ;;  %1566 = vmatprep.mubr.bf16.mxu1 %v154_v28  ;;  %v6253_v25 = vld [vmem:[#allocation8 + $0x4] ss:$24 sps:$4 sm:$0xff]   ;;  %v6254_v28 = vld [vmem:[#allocation8 + $0x8] ss:$24 sps:$4 sm:$0xff]  }
 0x103   :  { %1414 = vmatpush1.bf16.msra.mxu0 %v6161_v27  ;;  %1537 = vmatpush1.bf16.msra.mxu1 %v6164_v29  ;;  %v6251_v27 = vld [vmem:[#allocation8] ss:$24 sps:$4 sm:$0xff]   ;;  %v153_v29 = vpack.c.bf16 %v7307_v24, %v7307_v24  ;;  %v6274_v24 = vld [vmem:[#allocation8 + $0x9c] ss:$24 sps:$4 sm:$0xff]  }
 0x104   :  { %1415 = vmatprep.subr.bf16.mxu0 %v6169_v30  ;;  %1538 = vmatprep.subr.bf16.mxu1 %v6172_v9  ;;  %v6259_v30 = vld [vmem:[#allocation8 + $0x34] ss:$24 sps:$4 sm:$0xff]  }
 0x105   :  { %v6262_v9 = vld [vmem:[#allocation8 + $0x3c] ss:$24 sps:$4 sm:$0xff]  }
 0x107   :  { %1416 = vmatpush1.bf16.msra.mxu0 %v6167_v31  ;;  %1539 = vmatpush1.bf16.msra.mxu1 %v6170_v32  ;;  %v6257_v31 = vld [vmem:[#allocation8 + $0x30] ss:$24 sps:$4 sm:$0xff]  }
 0x108   :  { %1417 = vmatprep.subr.bf16.mxu0 %v6175_v33  ;;  %1540 = vmatprep.subr.bf16.mxu1 %v6178_v34  ;;  %v6260_v32 = vld [vmem:[#allocation8 + $0x38] ss:$24 sps:$4 sm:$0xff]   ;;  %v6265_v33 = vld [vmem:[#allocation8 + $0x64] ss:$24 sps:$4 sm:$0xff]  }
 0x109   :  { %v6268_v34 = vld [vmem:[#allocation8 + $0x6c] ss:$24 sps:$4 sm:$0xff]  }
 0x10b   :  { %1418 = vmatpush1.bf16.msra.mxu0 %v6173_v35  ;;  %1541 = vmatpush1.bf16.msra.mxu1 %v6176_v36  ;;  %v6263_v35 = vld [vmem:[#allocation8 + $0x60] ss:$24 sps:$4 sm:$0xff]  }
 0x10c   :  { %1419 = vmatprep.subr.bf16.mxu0 %v6181_v37  ;;  %1542 = vmatprep.subr.bf16.mxu1 %v6184_v38  ;;  %v6266_v36 = vld [vmem:[#allocation8 + $0x68] ss:$24 sps:$4 sm:$0xff]   ;;  %v6271_v37 = vld [vmem:[#allocation8 + $0x94] ss:$24 sps:$4 sm:$0xff]  }
 0x10d   :  { %v6269_v38 = vld [vmem:[#allocation8 + $0x90] ss:$24 sps:$4 sm:$0xff]  }
 0x10f   :  { %1420 = vmatpush1.bf16.msra.mxu0 %v6179_v39  ;;  %1543 = vmatpush1.bf16.msra.mxu1 %v6182_v40  ;;  %v6272_v39 = vld [vmem:[#allocation8 + $0x98] ss:$24 sps:$4 sm:$0xff]   ;;  %v6277_v40 = vld [vmem:[#allocation8 + $0xc4] ss:$24 sps:$4 sm:$0xff]  }
 0x110   :  { %1421 = vmatprep.subr.bf16.mxu0 %v6187_v41  ;;  %1544 = vmatprep.subr.bf16.mxu1 %v6190_v42  ;;  %v6280_v41 = vld [vmem:[#allocation8 + $0xcc] ss:$24 sps:$4 sm:$0xff]   ;;  %v6275_v42 = vld [vmem:[#allocation8 + $0xc0] ss:$24 sps:$4 sm:$0xff]  }
 0x113   :  { %1422 = vmatpush1.bf16.msra.mxu0 %v6185_v44  ;;  %1545 = vmatpush1.bf16.msra.mxu1 %v6188_v45  ;;  %v6278_v44 = vld [vmem:[#allocation8 + $0xc8] ss:$24 sps:$4 sm:$0xff]   ;;  %v6283_v45 = vld [vmem:[#allocation8 + $0xf4] ss:$24 sps:$4 sm:$0xff]  }
 0x114   :  { %1423 = vmatprep.subr.bf16.mxu0 %v6193_v46  ;;  %1546 = vmatprep.subr.bf16.mxu1 %v6196_v47  ;;  %v6286_v46 = vld [vmem:[#allocation8 + $0xfc] ss:$24 sps:$4 sm:$0xff]   ;;  %v6281_v47 = vld [vmem:[#allocation8 + $0xf0] ss:$24 sps:$4 sm:$0xff]  }
 0x117   :  { %1424 = vmatpush1.bf16.msra.mxu0 %v6191_v48  ;;  %1547 = vmatpush1.bf16.msra.mxu1 %v6194_v50  ;;  %v6284_v48 = vld [vmem:[#allocation8 + $0xf8] ss:$24 sps:$4 sm:$0xff]   ;;  %v6289_v50 = vld [vmem:[#allocation8 + $0x124] ss:$24 sps:$4 sm:$0xff]  }
 0x118   :  { %1425 = vmatprep.subr.bf16.mxu0 %v6199_v51  ;;  %1548 = vmatprep.subr.bf16.mxu1 %v6202_v52  ;;  %v6292_v51 = vld [vmem:[#allocation8 + $0x12c] ss:$24 sps:$4 sm:$0xff]   ;;  %v6287_v52 = vld [vmem:[#allocation8 + $0x120] ss:$24 sps:$4 sm:$0xff]  }
 0x11b   :  { %1426 = vmatpush1.bf16.msra.mxu0 %v6197_v53  ;;  %1549 = vmatpush1.bf16.msra.mxu1 %v6200_v54  ;;  %v6290_v53 = vld [vmem:[#allocation8 + $0x128] ss:$24 sps:$4 sm:$0xff]   ;;  %v6295_v54 = vld [vmem:[#allocation8 + $0x154] ss:$24 sps:$4 sm:$0xff]  }
 0x11c   :  { %1427 = vmatprep.subr.bf16.mxu0 %v6205_v55  ;;  %1550 = vmatprep.subr.bf16.mxu1 %v6208_v56  ;;  %v6298_v55 = vld [vmem:[#allocation8 + $0x15c] ss:$24 sps:$4 sm:$0xff]   ;;  %v6293_v56 = vld [vmem:[#allocation8 + $0x150] ss:$24 sps:$4 sm:$0xff]  }
 0x11f   :  { %1428 = vmatpush1.bf16.msra.mxu0 %v6203_v57  ;;  %1551 = vmatpush1.bf16.msra.mxu1 %v6206_v58  ;;  %v6296_v57 = vld [vmem:[#allocation8 + $0x158] ss:$24 sps:$4 sm:$0xff]   ;;  %v6301_v58 = vld [vmem:[#allocation8 + $0x184] ss:$24 sps:$4 sm:$0xff]  }
 0x120   :  { %1429 = vmatprep.subr.bf16.mxu0 %v6211_v59  ;;  %1552 = vmatprep.subr.bf16.mxu1 %v6214_v60  ;;  %v6304_v59 = vld [vmem:[#allocation8 + $0x18c] ss:$24 sps:$4 sm:$0xff]   ;;  %v6299_v60 = vld [vmem:[#allocation8 + $0x180] ss:$24 sps:$4 sm:$0xff]  }
 0x123   :  { %1430 = vmatpush1.bf16.msra.mxu0 %v6209_v61  ;;  %1553 = vmatpush1.bf16.msra.mxu1 %v6212_v62  ;;  %v6302_v61 = vld [vmem:[#allocation8 + $0x188] ss:$24 sps:$4 sm:$0xff]   ;;  %v6307_v62 = vld [vmem:[#allocation8 + $0x1b4] ss:$24 sps:$4 sm:$0xff]  }
 0x124   :  { %1431 = vmatprep.subr.bf16.mxu0 %v6217_v63  ;;  %1554 = vmatprep.subr.bf16.mxu1 %v6220_v0  ;;  %v6310_v63 = vld [vmem:[#allocation8 + $0x1bc] ss:$24 sps:$4 sm:$0xff]   ;;  %v6305_v0 = vld [vmem:[#allocation8 + $0x1b0] ss:$24 sps:$4 sm:$0xff]  }
 0x127   :  { %1432 = vmatpush1.bf16.msra.mxu0 %v6215_v1  ;;  %1555 = vmatpush1.bf16.msra.mxu1 %v6218_v2  ;;  %v6308_v1 = vld [vmem:[#allocation8 + $0x1b8] ss:$24 sps:$4 sm:$0xff]   ;;  %v6313_v2 = vld [vmem:[#allocation8 + $0x1e4] ss:$24 sps:$4 sm:$0xff]  }
 0x128   :  { %1433 = vmatprep.subr.bf16.mxu0 %v6223_v3  ;;  %1556 = vmatprep.subr.bf16.mxu1 %v6226_v4  ;;  %v6316_v3 = vld [vmem:[#allocation8 + $0x1ec] ss:$24 sps:$4 sm:$0xff]   ;;  %v6311_v4 = vld [vmem:[#allocation8 + $0x1e0] ss:$24 sps:$4 sm:$0xff]  }
 0x12b   :  { %1434 = vmatpush1.bf16.msra.mxu0 %v6221_v5  ;;  %1557 = vmatpush1.bf16.msra.mxu1 %v6224_v6  ;;  %v6314_v5 = vld [vmem:[#allocation8 + $0x1e8] ss:$24 sps:$4 sm:$0xff]   ;;  %v6319_v6 = vld [vmem:[#allocation8 + $0x214] ss:$24 sps:$4 sm:$0xff]  }
 0x12c   :  { %1435 = vmatprep.subr.bf16.mxu0 %v6229_v7  ;;  %1558 = vmatprep.subr.bf16.mxu1 %v6232_v8  ;;  %v6322_v7 = vld [vmem:[#allocation8 + $0x21c] ss:$24 sps:$4 sm:$0xff]   ;;  %v6317_v8 = vld [vmem:[#allocation8 + $0x210] ss:$24 sps:$4 sm:$0xff]  }
 0x12f   :  { %1436 = vmatpush1.bf16.msra.mxu0 %v6227_v10  ;;  %1559 = vmatpush1.bf16.msra.mxu1 %v6230_v11  ;;  %v6320_v10 = vld [vmem:[#allocation8 + $0x218] ss:$24 sps:$4 sm:$0xff]   ;;  %v6325_v11 = vld [vmem:[#allocation8 + $0x244] ss:$24 sps:$4 sm:$0xff]  }
 0x130   :  { %1437 = vmatprep.subr.bf16.mxu0 %v6235_v12  ;;  %1560 = vmatprep.subr.bf16.mxu1 %v6238_v13  ;;  %v6328_v12 = vld [vmem:[#allocation8 + $0x24c] ss:$24 sps:$4 sm:$0xff]   ;;  %v6323_v13 = vld [vmem:[#allocation8 + $0x240] ss:$24 sps:$4 sm:$0xff]  }
 0x133   :  { %1438 = vmatpush1.bf16.msra.mxu0 %v6233_v14  ;;  %1561 = vmatpush1.bf16.msra.mxu1 %v6236_v15  ;;  %v6326_v14 = vld [vmem:[#allocation8 + $0x248] ss:$24 sps:$4 sm:$0xff]   ;;  %v6331_v15 = vld [vmem:[#allocation8 + $0x274] ss:$24 sps:$4 sm:$0xff]  }
 0x134   :  { %1439 = vmatprep.subr.bf16.mxu0 %v6241_v16  ;;  %1562 = vmatprep.subr.bf16.mxu1 %v6244_v17  ;;  %v6334_v16 = vld [vmem:[#allocation8 + $0x27c] ss:$24 sps:$4 sm:$0xff]   ;;  %v6329_v17 = vld [vmem:[#allocation8 + $0x270] ss:$24 sps:$4 sm:$0xff]  }
 0x137   :  { %1440 = vmatpush1.bf16.msra.mxu0 %v6239_v18  ;;  %1563 = vmatpush1.bf16.msra.mxu1 %v6242_v19  ;;  %v6332_v18 = vld [vmem:[#allocation8 + $0x278] ss:$24 sps:$4 sm:$0xff]   ;;  %v6337_v19 = vld [vmem:[#allocation8 + $0x2a4] ss:$24 sps:$4 sm:$0xff]  }
 0x138   :  { %1441 = vmatprep.subr.bf16.mxu0 %v6247_v20  ;;  %1564 = vmatprep.subr.bf16.mxu1 %v6250_v21  ;;  %v6340_v20 = vld [vmem:[#allocation8 + $0x2ac] ss:$24 sps:$4 sm:$0xff]   ;;  %v6335_v21 = vld [vmem:[#allocation8 + $0x2a0] ss:$24 sps:$4 sm:$0xff]  }
 0x13b   :  { %1442 = vmatpush1.bf16.msra.mxu0 %v6245_v22  ;;  %1565 = vmatpush1.bf16.msra.mxu1 %v6248_v23  ;;  %v6338_v22 = vld [vmem:[#allocation8 + $0x2a8] ss:$24 sps:$4 sm:$0xff]   ;;  %v6343_v23 = vld [vmem:[#allocation8 + $0x2d4] ss:$24 sps:$4 sm:$0xff]  }
 0x13c   :  { %2767 = vmatprep.subr.bf16.mxu0 %v6253_v25  ;;  %2849 = vmatprep.subr.bf16.mxu1 %v6256_v26  ;;  %v6346_v25 = vld [vmem:[#allocation8 + $0x2dc] ss:$24 sps:$4 sm:$0xff]   ;;  %v6341_v26 = vld [vmem:[#allocation8 + $0x2d0] ss:$24 sps:$4 sm:$0xff]  }
 0x13e   :  { %1444 = vmatmul.mubr.bf16.vlgmr.msra.gmra.mrb[0].mxu0 %v153_v29  ;;  %1567 = vmatmul.mubr.bf16.vlgmr.msra.gmra.mrb[0].mxu1 %v153_v29  ;;  %v6352_v29 = vld [vmem:[#allocation8 + $0x30c] ss:$24 sps:$4 sm:$0xff]  }
 0x13f   :  { %2768 = vmatpush1.bf16.msra.mxu0 %v6251_v27  ;;  %2850 = vmatpush1.bf16.msra.mxu1 %v6254_v28  ;;  %v6344_v27 = vld [vmem:[#allocation8 + $0x2d8] ss:$24 sps:$4 sm:$0xff]   ;;  %v6349_v28 = vld [vmem:[#allocation8 + $0x304] ss:$24 sps:$4 sm:$0xff]  }
 0x140   :  { %2769 = vmatprep.subr.bf16.mxu0 %v6259_v30  ;;  %2851 = vmatprep.subr.bf16.mxu1 %v6262_v9  ;;  %v7314_v30 = vsub.s32 0, %v7294_v43  ;;  %v7316_v9 = vld [vmem:[#allocation7] sm:$0xf] }
 0x143   :  { %2770 = vmatpush1.bf16.msra.mxu0 %v6257_v31  ;;  %2852 = vmatpush1.bf16.msra.mxu1 %v6260_v32  ;;  %v7319_v31 = vsub.s32 1, %v7294_v43  ;;  %v7322_v32 = vsub.s32 3, %v7294_v43 }
 0x144   :  { %2771 = vmatprep.subr.bf16.mxu0 %v6265_v33  ;;  %2853 = vmatprep.subr.bf16.mxu1 %v6268_v34  ;;  %v352_v33 = vrot.slane %v7316_v9, %v7314_v30 }
 0x145   :  { %v356_v34 = vrot.slane %v7316_v9, %v7319_v31 }
 0x147   :  { %2772 = vmatpush1.bf16.msra.mxu0 %v6263_v35  ;;  %2854 = vmatpush1.bf16.msra.mxu1 %v6266_v36  ;;  %v364_v35 = vrot.slane %v7316_v9, %v7322_v32 }
 0x148   :  { %2773 = vmatprep.subr.bf16.mxu0 %v6271_v37  ;;  %2855 = vmatprep.subr.bf16.mxu1 %v6274_v24 }
 0x14b   :  { %2774 = vmatpush1.bf16.msra.mxu0 %v6269_v38  ;;  %2856 = vmatpush1.bf16.msra.mxu1 %v6272_v39 }
 0x14c   :  { %2775 = vmatprep.subr.bf16.mxu0 %v6277_v40  ;;  %2857 = vmatprep.subr.bf16.mxu1 %v6280_v41 }
 0x14f   :  { %2776 = vmatpush1.bf16.msra.mxu0 %v6275_v42  ;;  %2858 = vmatpush1.bf16.msra.mxu1 %v6278_v44 }
 0x150   :  { %2777 = vmatprep.subr.bf16.mxu0 %v6283_v45  ;;  %2859 = vmatprep.subr.bf16.mxu1 %v6286_v46 }
 0x153   :  { %2778 = vmatpush1.bf16.msra.mxu0 %v6281_v47  ;;  %2860 = vmatpush1.bf16.msra.mxu1 %v6284_v48 }
 0x154   :  { %2779 = vmatprep.subr.bf16.mxu0 %v6289_v50  ;;  %2861 = vmatprep.subr.bf16.mxu1 %v6292_v51 }
 0x157   :  { %2780 = vmatpush1.bf16.msra.mxu0 %v6287_v52  ;;  %2862 = vmatpush1.bf16.msra.mxu1 %v6290_v53  ;;  %v6347_v52 = vld [vmem:[#allocation8 + $0x300] ss:$24 sps:$4 sm:$0xff]  }
 0x158   :  { %2781 = vmatprep.subr.bf16.mxu0 %v6295_v54  ;;  %2863 = vmatprep.subr.bf16.mxu1 %v6298_v55  ;;  %v6350_v53 = vld [vmem:[#allocation8 + $0x308] ss:$24 sps:$4 sm:$0xff]   ;;  %v6355_v55 = vld [vmem:[#allocation8 + $0x334] ss:$24 sps:$4 sm:$0xff]  }
 0x15b   :  { %2782 = vmatpush1.bf16.msra.mxu0 %v6293_v56  ;;  %2864 = vmatpush1.bf16.msra.mxu1 %v6296_v57  ;;  %v6358_v56 = vld [vmem:[#allocation8 + $0x33c] ss:$24 sps:$4 sm:$0xff]  }
 0x15c   :  { %2783 = vmatprep.subr.bf16.mxu0 %v6301_v58  ;;  %2865 = vmatprep.subr.bf16.mxu1 %v6304_v59  ;;  %v6353_v58 = vld [vmem:[#allocation8 + $0x330] ss:$24 sps:$4 sm:$0xff]  }
 0x15d   :  { %v6356_v59 = vld [vmem:[#allocation8 + $0x338] ss:$24 sps:$4 sm:$0xff]  }
 0x15f   :  { %2784 = vmatpush1.bf16.msra.mxu0 %v6299_v60  ;;  %2866 = vmatpush1.bf16.msra.mxu1 %v6302_v61  ;;  %v6361_v60 = vld [vmem:[#allocation8 + $0x364] ss:$24 sps:$4 sm:$0xff]  }
 0x160   :  { %2785 = vmatprep.subr.bf16.mxu0 %v6307_v62  ;;  %2867 = vmatprep.subr.bf16.mxu1 %v6310_v63  ;;  %v6364_v61 = vld [vmem:[#allocation8 + $0x36c] ss:$24 sps:$4 sm:$0xff]   ;;  %v6359_v62 = vld [vmem:[#allocation8 + $0x360] ss:$24 sps:$4 sm:$0xff]  }
 0x161   :  { %v6362_v63 = vld [vmem:[#allocation8 + $0x368] ss:$24 sps:$4 sm:$0xff]  }
 0x163   :  { %2786 = vmatpush1.bf16.msra.mxu0 %v6305_v0  ;;  %2868 = vmatpush1.bf16.msra.mxu1 %v6308_v1  ;;  %v6367_v0 = vld [vmem:[#allocation8 + $0x394] ss:$24 sps:$4 sm:$0xff]  }
 0x164   :  { %2787 = vmatprep.subr.bf16.mxu0 %v6313_v2  ;;  %2869 = vmatprep.subr.bf16.mxu1 %v6316_v3  ;;  %v6370_v1 = vld [vmem:[#allocation8 + $0x39c] ss:$24 sps:$4 sm:$0xff]   ;;  %v6365_v2 = vld [vmem:[#allocation8 + $0x390] ss:$24 sps:$4 sm:$0xff]  }
 0x165   :  { %v6368_v3 = vld [vmem:[#allocation8 + $0x398] ss:$24 sps:$4 sm:$0xff]  }
 0x167   :  { %2788 = vmatpush1.bf16.msra.mxu0 %v6311_v4  ;;  %2870 = vmatpush1.bf16.msra.mxu1 %v6314_v5  ;;  %v6373_v4 = vld [vmem:[#allocation8 + $0x3c4] ss:$24 sps:$4 sm:$0xff]  }
 0x168   :  { %2789 = vmatprep.subr.bf16.mxu0 %v6319_v6  ;;  %2871 = vmatprep.subr.bf16.mxu1 %v6322_v7  ;;  %v6376_v5 = vld [vmem:[#allocation8 + $0x3cc] ss:$24 sps:$4 sm:$0xff]   ;;  %v6371_v6 = vld [vmem:[#allocation8 + $0x3c0] ss:$24 sps:$4 sm:$0xff]  }
 0x169   :  { %v6374_v7 = vld [vmem:[#allocation8 + $0x3c8] ss:$24 sps:$4 sm:$0xff]  }
 0x16b   :  { %2790 = vmatpush1.bf16.msra.mxu0 %v6317_v8  ;;  %2872 = vmatpush1.bf16.msra.mxu1 %v6320_v10  ;;  %v6379_v8 = vld [vmem:[#allocation8 + $0x3f4] ss:$24 sps:$4 sm:$0xff]  }
 0x16c   :  { %2791 = vmatprep.subr.bf16.mxu0 %v6325_v11  ;;  %2873 = vmatprep.subr.bf16.mxu1 %v6328_v12  ;;  %v6382_v10 = vld [vmem:[#allocation8 + $0x3fc] ss:$24 sps:$4 sm:$0xff]   ;;  %v6377_v11 = vld [vmem:[#allocation8 + $0x3f0] ss:$24 sps:$4 sm:$0xff]  }
 0x16d   :  { %v6380_v12 = vld [vmem:[#allocation8 + $0x3f8] ss:$24 sps:$4 sm:$0xff]  }
 0x16f   :  { %2792 = vmatpush1.bf16.msra.mxu0 %v6323_v13  ;;  %2874 = vmatpush1.bf16.msra.mxu1 %v6326_v14  ;;  %v6385_v13 = vld [vmem:[#allocation8 + $0x424] ss:$24 sps:$4 sm:$0xff]  }
 0x170   :  { %2793 = vmatprep.subr.bf16.mxu0 %v6331_v15  ;;  %2875 = vmatprep.subr.bf16.mxu1 %v6334_v16  ;;  %v6388_v14 = vld [vmem:[#allocation8 + $0x42c] ss:$24 sps:$4 sm:$0xff]   ;;  %v6383_v15 = vld [vmem:[#allocation8 + $0x420] ss:$24 sps:$4 sm:$0xff]  }
 0x171   :  { %v6386_v16 = vld [vmem:[#allocation8 + $0x428] ss:$24 sps:$4 sm:$0xff]  }
 0x173   :  { %2794 = vmatpush1.bf16.msra.mxu0 %v6329_v17  ;;  %2876 = vmatpush1.bf16.msra.mxu1 %v6332_v18  ;;  %v6391_v17 = vld [vmem:[#allocation8 + $0x454] ss:$24 sps:$4 sm:$0xff]  }
 0x174   :  { %2795 = vmatprep.subr.bf16.mxu0 %v6337_v19  ;;  %2877 = vmatprep.subr.bf16.mxu1 %v6340_v20  ;;  %v6394_v18 = vld [vmem:[#allocation8 + $0x45c] ss:$24 sps:$4 sm:$0xff]   ;;  %v6389_v19 = vld [vmem:[#allocation8 + $0x450] ss:$24 sps:$4 sm:$0xff]  }
 0x175   :  { %v6392_v20 = vld [vmem:[#allocation8 + $0x458] ss:$24 sps:$4 sm:$0xff]  }
 0x177   :  { %2796 = vmatpush1.bf16.msra.mxu0 %v6335_v21  ;;  %2878 = vmatpush1.bf16.msra.mxu1 %v6338_v22  ;;  %v6397_v21 = vld [vmem:[#allocation8 + $0x484] ss:$24 sps:$4 sm:$0xff]  }
 0x178   :  { %2797 = vmatprep.subr.bf16.mxu0 %v6343_v23  ;;  %2879 = vmatprep.subr.bf16.mxu1 %v6346_v25  ;;  %v6400_v22 = vld [vmem:[#allocation8 + $0x48c] ss:$24 sps:$4 sm:$0xff]   ;;  %v6395_v23 = vld [vmem:[#allocation8 + $0x480] ss:$24 sps:$4 sm:$0xff]  }
 0x179   :  { %v6398_v25 = vld [vmem:[#allocation8 + $0x488] ss:$24 sps:$4 sm:$0xff]  }
 0x17b   :  { %2798 = vmatpush1.bf16.msra.mxu0 %v6341_v26  ;;  %2880 = vmatpush1.bf16.msra.mxu1 %v6344_v27  ;;  %v6403_v26 = vld [vmem:[#allocation8 + $0x4b4] ss:$24 sps:$4 sm:$0xff]  }
 0x17c   :  { %2808 = vmatprep.subr.bf16.mxu0 %v6349_v28  ;;  %2890 = vmatprep.subr.bf16.mxu1 %v6352_v29  ;;  %v6406_v27 = vld [vmem:[#allocation8 + $0x4bc] ss:$24 sps:$4 sm:$0xff]   ;;  %v6401_v28 = vld [vmem:[#allocation8 + $0x4b0] ss:$24 sps:$4 sm:$0xff]  }
 0x17d   :  { %v6404_v29 = vld [vmem:[#allocation8 + $0x4b8] ss:$24 sps:$4 sm:$0xff]  }
 0x211   :  { %v1445_v36 = vpop.f32.mrb[0].mxu0  ;;  %v7330_v37 = vpop.f32.mrb[0].mxu1 }
 0x212   :  { %v5881_v24 = vadd.f32 %v1445_v36, %v352_v33  ;;  %v1447_v38 = vpop.f32.mrb[1].mxu0  ;;  %v1570_v39 = vpop.f32.mrb[1].mxu1  ;;  %v6409_v33 = vld [vmem:[#allocation8 + $0x4e4] ss:$24 sps:$4 sm:$0xff]   ;;  %v6410_v36 = vld [vmem:[#allocation8 + $0x4e8] ss:$24 sps:$4 sm:$0xff]  }
 0x213   :  { %v5882_v40 = vadd.f32 %v1447_v38, %v356_v34  ;;  %v5884_v41 = vadd.f32 %v1570_v39, %v364_v35  ;;  %v1449_v42 = vpop.f32.mrb[2].mxu0  ;;  %v1572_v44 = vpop.f32.mrb[2].mxu1  ;;  %v6412_v34 = vld [vmem:[#allocation8 + $0x4ec] ss:$24 sps:$4 sm:$0xff]   ;;  %v6407_v35 = vld [vmem:[#allocation8 + $0x4e0] ss:$24 sps:$4 sm:$0xff]  }
 0x214   :  { %v1575_v45 = vmax.f32 %v5881_v24, 0.0  ;;  %v1450_v46 = vpop.f32.mrb[3].mxu0  ;;  %v1573_v47 = vpop.f32.mrb[3].mxu1  ;;  %v6415_v24 = vld [vmem:[#allocation8 + $0x514] ss:$24 sps:$4 sm:$0xff]  }
 0x215   :  { %v1576_v48 = vmax.f32 %v5882_v40, 0.0  ;;  %v1578_v50 = vmax.f32 %v5884_v41, 0.0  ;;  %v6418_v38 = vld [vmem:[#allocation8 + $0x51c] ss:$24 sps:$4 sm:$0xff]   ;;  %v6413_v39 = vld [vmem:[#allocation8 + $0x510] ss:$24 sps:$4 sm:$0xff]  }
 0x216   :  { %v7334_v54 = vpack.c.bf16 %v1575_v45, %v1575_v45  ;;  %v6416_v40 = vld [vmem:[#allocation8 + $0x518] ss:$24 sps:$4 sm:$0xff]   ;;  %v6421_v41 = vld [vmem:[#allocation8 + $0x544] ss:$24 sps:$4 sm:$0xff]   ;;  %v6422_v45 = vld [vmem:[#allocation8 + $0x548] ss:$24 sps:$4 sm:$0xff]  }
 0x217   :  { %v7332_v51 = vpack.c.bf16 %v1576_v48, %v1576_v48  ;;  %v7338_v57 = vpack.c.bf16 %v1578_v50, %v1578_v50  ;;  %v6424_v42 = vld [vmem:[#allocation8 + $0x54c] ss:$24 sps:$4 sm:$0xff]   ;;  %v6419_v44 = vld [vmem:[#allocation8 + $0x540] ss:$24 sps:$4 sm:$0xff]   ;;  %v7345_v46 = vsub.s32 2, %v7294_v43 }
 0x218   :  { %v6427_v47 = vld [vmem:[#allocation8 + $0x574] ss:$24 sps:$4 sm:$0xff]   ;;  %v6425_v50 = vld [vmem:[#allocation8 + $0x570] ss:$24 sps:$4 sm:$0xff]  }
 0x219   :  { %2799 = vmatprep.mubr.bf16.mxu0 %v7332_v51  ;;  %2881 = vmatprep.mubr.bf16.mxu1 %v7332_v51  ;;  %v6430_v48 = vld [vmem:[#allocation8 + $0x57c] ss:$24 sps:$4 sm:$0xff]  }
 0x21a   :  { %2800 = vmatmul.mubr.bf16.vlgmr.msra.gmra.mrb[4].mxu0 %v7334_v54  ;;  %2882 = vmatmul.mubr.bf16.vlgmr.msra.gmra.mrb[4].mxu1 %v7334_v54 }
 0x21b   :  { %2809 = vmatpush1.bf16.msra.mxu0 %v6347_v52  ;;  %2891 = vmatpush1.bf16.msra.mxu1 %v6350_v53  ;;  %v6428_v52 = vld [vmem:[#allocation8 + $0x578] ss:$24 sps:$4 sm:$0xff]   ;;  %v360_v53 = vrot.slane %v7316_v9, %v7345_v46  ;;  %v6445_v9 = vld [vmem:[#allocation8 + $0x14] ss:$24 sps:$4 sm:$0xff]  }
 0x21c   :  { %2840 = vmatprep.mubr.bf16.mxu0 %v7338_v57  ;;  %2922 = vmatprep.mubr.bf16.mxu1 %v7338_v57 }
 0x21d   :  { %2810 = vmatprep.subr.bf16.mxu0 %v6355_v55  ;;  %2892 = vmatprep.subr.bf16.mxu1 %v6358_v56  ;;  %v6433_v55 = vld [vmem:[#allocation8 + $0x5a4] ss:$24 sps:$4 sm:$0xff]  }
 0x21e   :  { %v6436_v56 = vld [vmem:[#allocation8 + $0x5ac] ss:$24 sps:$4 sm:$0xff]  }
 0x21f   :  { %2811 = vmatpush1.bf16.msra.mxu0 %v6353_v58  ;;  %2893 = vmatpush1.bf16.msra.mxu1 %v6356_v59  ;;  %v6431_v58 = vld [vmem:[#allocation8 + $0x5a0] ss:$24 sps:$4 sm:$0xff]  }
 0x220   :  { %2812 = vmatprep.subr.bf16.mxu0 %v6361_v60  ;;  %2894 = vmatprep.subr.bf16.mxu1 %v6364_v61  ;;  %v6434_v59 = vld [vmem:[#allocation8 + $0x5a8] ss:$24 sps:$4 sm:$0xff]   ;;  %v5883_v60 = vadd.f32 %v7330_v37, %v360_v53  ;;  %v6439_v61 = vld [vmem:[#allocation8 + $0x5d4] ss:$24 sps:$4 sm:$0xff]  }
 0x221   :  { %v6539_v37 = vld [vmem:[#allocation11] ss:$24 sps:$4 sm:$0xff]  }
 0x222   :  { %v6599_v53 = vld [vmem:[#allocation11 + $0x1e0] ss:$24 sps:$4 sm:$0xff]  }
 0x223   :  { %2813 = vmatpush1.bf16.msra.mxu0 %v6359_v62  ;;  %2895 = vmatpush1.bf16.msra.mxu1 %v6362_v63  ;;  %v6442_v62 = vld [vmem:[#allocation8 + $0x5dc] ss:$24 sps:$4 sm:$0xff]   ;;  %v6437_v63 = vld [vmem:[#allocation8 + $0x5d0] ss:$24 sps:$4 sm:$0xff]  }
 0x224   :  { %2814 = vmatprep.subr.bf16.mxu0 %v6367_v0  ;;  %2896 = vmatprep.subr.bf16.mxu1 %v6370_v1  ;;  %v6440_v0 = vld [vmem:[#allocation8 + $0x5d8] ss:$24 sps:$4 sm:$0xff]   ;;  %v1577_v1 = vmax.f32 %v5883_v60, 0.0 }
 0x225   :  { %v6479_v60 = vld [vmem:[#allocation8 + $0x250] ss:$24 sps:$4 sm:$0xff]  }
 0x227   :  { %2815 = vmatpush1.bf16.msra.mxu0 %v6365_v2  ;;  %2897 = vmatpush1.bf16.msra.mxu1 %v6368_v3  ;;  %v6443_v2 = vld [vmem:[#allocation8 + $0x10] ss:$24 sps:$4 sm:$0xff]   ;;  %v7350_v3 = vpack.c.bf16 %v1577_v1, %v1577_v1 }
 0x228   :  { %2816 = vmatprep.subr.bf16.mxu0 %v6373_v4  ;;  %2898 = vmatprep.subr.bf16.mxu1 %v6376_v5  ;;  %v6448_v4 = vld [vmem:[#allocation8 + $0x44] ss:$24 sps:$4 sm:$0xff]  }
 0x229   :  { %v6541_v5 = vld [vmem:[#allocation11 + $0x4] ss:$24 sps:$4 sm:$0xff]   ;;  %v6619_v1 = vld [vmem:[#allocation11 + $0x274] ss:$24 sps:$4 sm:$0xff]  }
 0x22b   :  { %2817 = vmatpush1.bf16.msra.mxu0 %v6371_v6  ;;  %2899 = vmatpush1.bf16.msra.mxu1 %v6374_v7  ;;  %v6446_v6 = vld [vmem:[#allocation8 + $0x40] ss:$24 sps:$4 sm:$0xff]  }
 0x22c   :  { %2818 = vmatprep.subr.bf16.mxu0 %v6379_v8  ;;  %2900 = vmatprep.subr.bf16.mxu1 %v6382_v10  ;;  %v6547_v7 = vld [vmem:[#allocation11 + $0x34] ss:$24 sps:$4 sm:$0xff]   ;;  %v6545_v10 = vld [vmem:[#allocation11 + $0x30] ss:$24 sps:$4 sm:$0xff]  }
 0x22d   :  { %v6451_v8 = vld [vmem:[#allocation8 + $0x74] ss:$24 sps:$4 sm:$0xff]  }
 0x22f   :  { %2819 = vmatpush1.bf16.msra.mxu0 %v6377_v11  ;;  %2901 = vmatpush1.bf16.msra.mxu1 %v6380_v12  ;;  %v6449_v11 = vld [vmem:[#allocation8 + $0x70] ss:$24 sps:$4 sm:$0xff]  }
 0x230   :  { %2820 = vmatprep.subr.bf16.mxu0 %v6385_v13  ;;  %2902 = vmatprep.subr.bf16.mxu1 %v6388_v14  ;;  %v6553_v12 = vld [vmem:[#allocation11 + $0x64] ss:$24 sps:$4 sm:$0xff]   ;;  %v6551_v14 = vld [vmem:[#allocation11 + $0x60] ss:$24 sps:$4 sm:$0xff]  }
 0x231   :  { %v6454_v13 = vld [vmem:[#allocation8 + $0xa4] ss:$24 sps:$4 sm:$0xff]  }
 0x233   :  { %2821 = vmatpush1.bf16.msra.mxu0 %v6383_v15  ;;  %2903 = vmatpush1.bf16.msra.mxu1 %v6386_v16  ;;  %v6452_v15 = vld [vmem:[#allocation8 + $0xa0] ss:$24 sps:$4 sm:$0xff]  }
 0x234   :  { %2822 = vmatprep.subr.bf16.mxu0 %v6391_v17  ;;  %2904 = vmatprep.subr.bf16.mxu1 %v6394_v18  ;;  %v6559_v16 = vld [vmem:[#allocation11 + $0x94] ss:$24 sps:$4 sm:$0xff]   ;;  %v6557_v17 = vld [vmem:[#allocation11 + $0x90] ss:$24 sps:$4 sm:$0xff]  }
 0x235   :  { %v6455_v18 = vld [vmem:[#allocation8 + $0xd0] ss:$24 sps:$4 sm:$0xff]  }
 0x237   :  { %2823 = vmatpush1.bf16.msra.mxu0 %v6389_v19  ;;  %2905 = vmatpush1.bf16.msra.mxu1 %v6392_v20  ;;  %v6565_v19 = vld [vmem:[#allocation11 + $0xc4] ss:$24 sps:$4 sm:$0xff]  }
 0x238   :  { %2824 = vmatprep.subr.bf16.mxu0 %v6397_v21  ;;  %2906 = vmatprep.subr.bf16.mxu1 %v6400_v22  ;;  %v6460_v20 = vld [vmem:[#allocation8 + $0x104] ss:$24 sps:$4 sm:$0xff]   ;;  %v6458_v22 = vld [vmem:[#allocation8 + $0x100] ss:$24 sps:$4 sm:$0xff]  }
 0x239   :  { %v6563_v21 = vld [vmem:[#allocation11 + $0xc0] ss:$24 sps:$4 sm:$0xff]  }
 0x23b   :  { %2825 = vmatpush1.bf16.msra.mxu0 %v6395_v23  ;;  %2907 = vmatpush1.bf16.msra.mxu1 %v6398_v25  ;;  %v6571_v23 = vld [vmem:[#allocation11 + $0xf4] ss:$24 sps:$4 sm:$0xff]  }
 0x23c   :  { %2826 = vmatprep.subr.bf16.mxu0 %v6403_v26  ;;  %2908 = vmatprep.subr.bf16.mxu1 %v6406_v27  ;;  %v6463_v25 = vld [vmem:[#allocation8 + $0x134] ss:$24 sps:$4 sm:$0xff]   ;;  %v6461_v27 = vld [vmem:[#allocation8 + $0x130] ss:$24 sps:$4 sm:$0xff]  }
 0x23d   :  { %v6569_v26 = vld [vmem:[#allocation11 + $0xf0] ss:$24 sps:$4 sm:$0xff]  }
 0x23f   :  { %2827 = vmatpush1.bf16.msra.mxu0 %v6401_v28  ;;  %2909 = vmatpush1.bf16.msra.mxu1 %v6404_v29  ;;  %v6577_v28 = vld [vmem:[#allocation11 + $0x124] ss:$24 sps:$4 sm:$0xff]  }
 0x240   :  { %2828 = vmatprep.subr.bf16.mxu0 %v6409_v33  ;;  %2910 = vmatprep.subr.bf16.mxu1 %v6412_v34  ;;  %v6466_v29 = vld [vmem:[#allocation8 + $0x164] ss:$24 sps:$4 sm:$0xff]   ;;  %v6464_v34 = vld [vmem:[#allocation8 + $0x160] ss:$24 sps:$4 sm:$0xff]  }
 0x241   :  { %v6575_v33 = vld [vmem:[#allocation11 + $0x120] ss:$24 sps:$4 sm:$0xff]  }
 0x243   :  { %2829 = vmatpush1.bf16.msra.mxu0 %v6407_v35  ;;  %2911 = vmatpush1.bf16.msra.mxu1 %v6410_v36  ;;  %v6583_v35 = vld [vmem:[#allocation11 + $0x154] ss:$24 sps:$4 sm:$0xff]  }
 0x244   :  { %2830 = vmatprep.subr.bf16.mxu0 %v6415_v24  ;;  %2912 = vmatprep.subr.bf16.mxu1 %v6418_v38  ;;  %v6469_v36 = vld [vmem:[#allocation8 + $0x194] ss:$24 sps:$4 sm:$0xff]   ;;  %v6467_v38 = vld [vmem:[#allocation8 + $0x190] ss:$24 sps:$4 sm:$0xff]  }
 0x245   :  { %v6581_v24 = vld [vmem:[#allocation11 + $0x150] ss:$24 sps:$4 sm:$0xff]  }
 0x247   :  { %2831 = vmatpush1.bf16.msra.mxu0 %v6413_v39  ;;  %2913 = vmatpush1.bf16.msra.mxu1 %v6416_v40  ;;  %v6589_v39 = vld [vmem:[#allocation11 + $0x184] ss:$24 sps:$4 sm:$0xff]  }
 0x248   :  { %2832 = vmatprep.subr.bf16.mxu0 %v6421_v41  ;;  %2914 = vmatprep.subr.bf16.mxu1 %v6424_v42  ;;  %v6472_v40 = vld [vmem:[#allocation8 + $0x1c4] ss:$24 sps:$4 sm:$0xff]   ;;  %v6470_v42 = vld [vmem:[#allocation8 + $0x1c0] ss:$24 sps:$4 sm:$0xff]  }
 0x249   :  { %v6587_v41 = vld [vmem:[#allocation11 + $0x180] ss:$24 sps:$4 sm:$0xff]  }
 0x24b   :  { %2833 = vmatpush1.bf16.msra.mxu0 %v6419_v44  ;;  %2915 = vmatpush1.bf16.msra.mxu1 %v6422_v45  ;;  %v6595_v44 = vld [vmem:[#allocation11 + $0x1b4] ss:$24 sps:$4 sm:$0xff]  }
 0x24c   :  { %2834 = vmatprep.subr.bf16.mxu0 %v6427_v47  ;;  %2916 = vmatprep.subr.bf16.mxu1 %v6430_v48  ;;  %v6475_v45 = vld [vmem:[#allocation8 + $0x1f4] ss:$24 sps:$4 sm:$0xff]   ;;  %v6473_v48 = vld [vmem:[#allocation8 + $0x1f0] ss:$24 sps:$4 sm:$0xff]  }
 0x24d   :  { %v6593_v47 = vld [vmem:[#allocation11 + $0x1b0] ss:$24 sps:$4 sm:$0xff]  }
 0x24f   :  { %2835 = vmatpush1.bf16.msra.mxu0 %v6425_v50  ;;  %2917 = vmatpush1.bf16.msra.mxu1 %v6428_v52  ;;  %v6601_v50 = vld [vmem:[#allocation11 + $0x1e4] ss:$24 sps:$4 sm:$0xff]  }
 0x250   :  { %2836 = vmatprep.subr.bf16.mxu0 %v6433_v55  ;;  %2918 = vmatprep.subr.bf16.mxu1 %v6436_v56  ;;  %v6478_v52 = vld [vmem:[#allocation8 + $0x224] ss:$24 sps:$4 sm:$0xff]   ;;  %v6476_v55 = vld [vmem:[#allocation8 + $0x220] ss:$24 sps:$4 sm:$0xff]  }
 0x251   :  { %v6607_v56 = vld [vmem:[#allocation11 + $0x214] ss:$24 sps:$4 sm:$0xff]  }
 0x253   :  { %2837 = vmatpush1.bf16.msra.mxu0 %v6431_v58  ;;  %2919 = vmatpush1.bf16.msra.mxu1 %v6434_v59  ;;  %v6481_v58 = vld [vmem:[#allocation8 + $0x254] ss:$24 sps:$4 sm:$0xff]  }
 0x254   :  { %2838 = vmatprep.subr.bf16.mxu0 %v6439_v61  ;;  %2920 = vmatprep.subr.bf16.mxu1 %v6442_v62  ;;  %v6605_v59 = vld [vmem:[#allocation11 + $0x210] ss:$24 sps:$4 sm:$0xff]   ;;  %v6613_v61 = vld [vmem:[#allocation11 + $0x244] ss:$24 sps:$4 sm:$0xff]  }
 0x255   :  { %v6484_v62 = vld [vmem:[#allocation8 + $0x284] ss:$24 sps:$4 sm:$0xff]  }
 0x257   :  { %2839 = vmatpush1.bf16.msra.mxu0 %v6437_v63  ;;  %2921 = vmatpush1.bf16.msra.mxu1 %v6440_v0  ;;  %v6611_v63 = vld [vmem:[#allocation11 + $0x240] ss:$24 sps:$4 sm:$0xff]  }
 0x258   :  { %2931 = vmatprep.subr.bf16.mxu0 %v6445_v9  ;;  %4785 = vmatprep.subr.bf16.mxu1 %v6541_v5  ;;  %v6482_v0 = vld [vmem:[#allocation8 + $0x280] ss:$24 sps:$4 sm:$0xff]   ;;  %v6487_v9 = vld [vmem:[#allocation8 + $0x2b4] ss:$24 sps:$4 sm:$0xff]  }
 0x259   :  { %v6488_v5 = vld [vmem:[#allocation8 + $0x2e0] ss:$24 sps:$4 sm:$0xff]  }
 0x25a   :  { %2841 = vmatmul.mubr.bf16.vlgmr.msra.gmra.mrb[4].mxu0 %v7350_v3  ;;  %2923 = vmatmul.mubr.bf16.vlgmr.msra.gmra.mrb[4].mxu1 %v7350_v3 }
 0x25b   :  { %2932 = vmatpush1.bf16.msra.mxu0 %v6443_v2  ;;  %2963 = vmatprep.mubr.bf16.mxu0 %v7332_v51  ;;  %v6457_v51 = vld [vmem:[#allocation8 + $0xd4] ss:$24 sps:$4 sm:$0xff]  }
 0x25c   :  { %2933 = vmatprep.subr.bf16.mxu0 %v6448_v4  ;;  %4786 = vmatpush1.bf16.msra.mxu1 %v6539_v37  ;;  %v6617_v2 = vld [vmem:[#allocation11 + $0x270] ss:$24 sps:$4 sm:$0xff]   ;;  %v6490_v37 = vld [vmem:[#allocation8 + $0x2e4] ss:$24 sps:$4 sm:$0xff]  }
 0x25d   :  { %4787 = vmatprep.subr.bf16.mxu1 %v6547_v7  ;;  %v6485_v4 = vld [vmem:[#allocation8 + $0x2b0] ss:$24 sps:$4 sm:$0xff]  }
 0x25e   :  { %v6491_v7 = vld [vmem:[#allocation8 + $0x310] ss:$24 sps:$4 sm:$0xff]  }
 0x25f   :  { %2934 = vmatpush1.bf16.msra.mxu0 %v6446_v6  ;;  %v6493_v6 = vld [vmem:[#allocation8 + $0x314] ss:$24 sps:$4 sm:$0xff]  }
 0x260   :  { %2935 = vmatprep.subr.bf16.mxu0 %v6451_v8  ;;  %4788 = vmatpush1.bf16.msra.mxu1 %v6545_v10  ;;  %v6496_v8 = vld [vmem:[#allocation8 + $0x344] ss:$24 sps:$4 sm:$0xff]   ;;  %v6494_v10 = vld [vmem:[#allocation8 + $0x340] ss:$24 sps:$4 sm:$0xff]  }
 0x261   :  { %4789 = vmatprep.subr.bf16.mxu1 %v6553_v12  ;;  %v6497_v12 = vld [vmem:[#allocation8 + $0x370] ss:$24 sps:$4 sm:$0xff]  }
 0x263   :  { %2936 = vmatpush1.bf16.msra.mxu0 %v6449_v11  ;;  %v6499_v11 = vld [vmem:[#allocation8 + $0x374] ss:$24 sps:$4 sm:$0xff]  }
 0x264   :  { %2937 = vmatprep.subr.bf16.mxu0 %v6454_v13  ;;  %4790 = vmatpush1.bf16.msra.mxu1 %v6551_v14  ;;  %v6502_v13 = vld [vmem:[#allocation8 + $0x3a4] ss:$24 sps:$4 sm:$0xff]   ;;  %v6500_v14 = vld [vmem:[#allocation8 + $0x3a0] ss:$24 sps:$4 sm:$0xff]  }
 0x265   :  { %4791 = vmatprep.subr.bf16.mxu1 %v6559_v16  ;;  %v6503_v16 = vld [vmem:[#allocation8 + $0x3d0] ss:$24 sps:$4 sm:$0xff]  }
 0x267   :  { %2938 = vmatpush1.bf16.msra.mxu0 %v6452_v15  ;;  %v6505_v15 = vld [vmem:[#allocation8 + $0x3d4] ss:$24 sps:$4 sm:$0xff]  }
 0x268   :  { %2939 = vmatprep.subr.bf16.mxu0 %v6457_v51  ;;  %4792 = vmatpush1.bf16.msra.mxu1 %v6557_v17  ;;  %v6508_v51 = vld [vmem:[#allocation8 + $0x404] ss:$24 sps:$4 sm:$0xff]  }
 0x269   :  { %4793 = vmatprep.subr.bf16.mxu1 %v6565_v19  ;;  %v6625_v17 = vld [vmem:[#allocation11 + $0x2a4] ss:$24 sps:$4 sm:$0xff]  }
 0x26a   :  { %v6509_v19 = vld [vmem:[#allocation8 + $0x430] ss:$24 sps:$4 sm:$0xff]  }
 0x26b   :  { %2940 = vmatpush1.bf16.msra.mxu0 %v6455_v18  ;;  %v6623_v18 = vld [vmem:[#allocation11 + $0x2a0] ss:$24 sps:$4 sm:$0xff]  }
 0x26c   :  { %2941 = vmatprep.subr.bf16.mxu0 %v6460_v20  ;;  %4794 = vmatpush1.bf16.msra.mxu1 %v6563_v21  ;;  %v6631_v20 = vld [vmem:[#allocation11 + $0x2d4] ss:$24 sps:$4 sm:$0xff]  }
 0x26d   :  { %4795 = vmatprep.subr.bf16.mxu1 %v6571_v23  ;;  %v6514_v21 = vld [vmem:[#allocation8 + $0x464] ss:$24 sps:$4 sm:$0xff]   ;;  %v6512_v23 = vld [vmem:[#allocation8 + $0x460] ss:$24 sps:$4 sm:$0xff]  }
 0x26f   :  { %2942 = vmatpush1.bf16.msra.mxu0 %v6458_v22  ;;  %v6629_v22 = vld [vmem:[#allocation11 + $0x2d0] ss:$24 sps:$4 sm:$0xff]  }
 0x270   :  { %2943 = vmatprep.subr.bf16.mxu0 %v6463_v25  ;;  %4796 = vmatpush1.bf16.msra.mxu1 %v6569_v26  ;;  %v6637_v25 = vld [vmem:[#allocation11 + $0x304] ss:$24 sps:$4 sm:$0xff]  }
 0x271   :  { %4797 = vmatprep.subr.bf16.mxu1 %v6577_v28  ;;  %v6517_v26 = vld [vmem:[#allocation8 + $0x494] ss:$24 sps:$4 sm:$0xff]   ;;  %v6520_v28 = vld [vmem:[#allocation8 + $0x4c4] ss:$24 sps:$4 sm:$0xff]  }
 0x273   :  { %2944 = vmatpush1.bf16.msra.mxu0 %v6461_v27  ;;  %v6515_v27 = vld [vmem:[#allocation8 + $0x490] ss:$24 sps:$4 sm:$0xff]  }
 0x274   :  { %2945 = vmatprep.subr.bf16.mxu0 %v6466_v29  ;;  %4798 = vmatpush1.bf16.msra.mxu1 %v6575_v33  ;;  %v6518_v29 = vld [vmem:[#allocation8 + $0x4c0] ss:$24 sps:$4 sm:$0xff]   ;;  %v6523_v33 = vld [vmem:[#allocation8 + $0x4f4] ss:$24 sps:$4 sm:$0xff]  }
 0x275   :  { %4799 = vmatprep.subr.bf16.mxu1 %v6583_v35  ;;  %v6526_v35 = vld [vmem:[#allocation8 + $0x524] ss:$24 sps:$4 sm:$0xff]  }
 0x277   :  { %2946 = vmatpush1.bf16.msra.mxu0 %v6464_v34  ;;  %v6521_v34 = vld [vmem:[#allocation8 + $0x4f0] ss:$24 sps:$4 sm:$0xff]  }
 0x278   :  { %2947 = vmatprep.subr.bf16.mxu0 %v6469_v36  ;;  %4800 = vmatpush1.bf16.msra.mxu1 %v6581_v24  ;;  %v6524_v36 = vld [vmem:[#allocation8 + $0x520] ss:$24 sps:$4 sm:$0xff]   ;;  %v6529_v24 = vld [vmem:[#allocation8 + $0x554] ss:$24 sps:$4 sm:$0xff]  }
 0x279   :  { %4801 = vmatprep.subr.bf16.mxu1 %v6589_v39  ;;  %v6532_v39 = vld [vmem:[#allocation8 + $0x584] ss:$24 sps:$4 sm:$0xff]  }
 0x27b   :  { %2948 = vmatpush1.bf16.msra.mxu0 %v6467_v38  ;;  %v6527_v38 = vld [vmem:[#allocation8 + $0x550] ss:$24 sps:$4 sm:$0xff]  }
 0x27c   :  { %2949 = vmatprep.subr.bf16.mxu0 %v6472_v40  ;;  %4802 = vmatpush1.bf16.msra.mxu1 %v6587_v41  ;;  %v6530_v40 = vld [vmem:[#allocation8 + $0x580] ss:$24 sps:$4 sm:$0xff]   ;;  %v6535_v41 = vld [vmem:[#allocation8 + $0x5b4] ss:$24 sps:$4 sm:$0xff]  }
 0x27d   :  { %4803 = vmatprep.subr.bf16.mxu1 %v6595_v44  ;;  %v6538_v44 = vld [vmem:[#allocation8 + $0x5e4] ss:$24 sps:$4 sm:$0xff]  }
 0x27f   :  { %2950 = vmatpush1.bf16.msra.mxu0 %v6470_v42  ;;  %v6533_v42 = vld [vmem:[#allocation8 + $0x5b0] ss:$24 sps:$4 sm:$0xff]  }
 0x280   :  { %2951 = vmatprep.subr.bf16.mxu0 %v6475_v45  ;;  %4804 = vmatpush1.bf16.msra.mxu1 %v6593_v47  ;;  %v6536_v45 = vld [vmem:[#allocation8 + $0x5e0] ss:$24 sps:$4 sm:$0xff]   ;;  %v6544_v47 = vld [vmem:[#allocation11 + $0xc] ss:$24 sps:$4 sm:$0xff]  }
 0x281   :  { %4805 = vmatprep.subr.bf16.mxu1 %v6601_v50  ;;  %v6550_v50 = vld [vmem:[#allocation11 + $0x3c] ss:$24 sps:$4 sm:$0xff]  }
 0x283   :  { %2952 = vmatpush1.bf16.msra.mxu0 %v6473_v48  ;;  %v6542_v48 = vld [vmem:[#allocation11 + $0x8] ss:$24 sps:$4 sm:$0xff]  }
 0x284   :  { %2953 = vmatprep.subr.bf16.mxu0 %v6478_v52  ;;  %4806 = vmatpush1.bf16.msra.mxu1 %v6599_v53  ;;  %v6548_v52 = vld [vmem:[#allocation11 + $0x38] ss:$24 sps:$4 sm:$0xff]   ;;  %v6556_v53 = vld [vmem:[#allocation11 + $0x6c] ss:$24 sps:$4 sm:$0xff]  }
 0x285   :  { %4807 = vmatprep.subr.bf16.mxu1 %v6607_v56  ;;  %v6562_v56 = vld [vmem:[#allocation11 + $0x9c] ss:$24 sps:$4 sm:$0xff]  }
 0x287   :  { %2954 = vmatpush1.bf16.msra.mxu0 %v6476_v55  ;;  %v6554_v55 = vld [vmem:[#allocation11 + $0x68] ss:$24 sps:$4 sm:$0xff]  }
 0x288   :  { %2955 = vmatprep.subr.bf16.mxu0 %v6481_v58  ;;  %4808 = vmatpush1.bf16.msra.mxu1 %v6605_v59  ;;  %v6560_v58 = vld [vmem:[#allocation11 + $0x98] ss:$24 sps:$4 sm:$0xff]   ;;  %v6568_v59 = vld [vmem:[#allocation11 + $0xcc] ss:$24 sps:$4 sm:$0xff]  }
 0x289   :  { %4809 = vmatprep.subr.bf16.mxu1 %v6613_v61  ;;  %v6574_v61 = vld [vmem:[#allocation11 + $0xfc] ss:$24 sps:$4 sm:$0xff]  }
 0x28b   :  { %2956 = vmatpush1.bf16.msra.mxu0 %v6479_v60  ;;  %v6566_v60 = vld [vmem:[#allocation11 + $0xc8] ss:$24 sps:$4 sm:$0xff]  }
 0x28c   :  { %2957 = vmatprep.subr.bf16.mxu0 %v6484_v62  ;;  %4810 = vmatpush1.bf16.msra.mxu1 %v6611_v63  ;;  %v6572_v62 = vld [vmem:[#allocation11 + $0xf8] ss:$24 sps:$4 sm:$0xff]   ;;  %v6578_v63 = vld [vmem:[#allocation11 + $0x128] ss:$24 sps:$4 sm:$0xff]  }
 0x28d   :  { %4811 = vmatprep.subr.bf16.mxu1 %v6619_v1  ;;  %v6584_v1 = vld [vmem:[#allocation11 + $0x158] ss:$24 sps:$4 sm:$0xff]  }
 0x28f   :  { %2958 = vmatpush1.bf16.msra.mxu0 %v6482_v0  ;;  %v6586_v0 = vld [vmem:[#allocation11 + $0x15c] ss:$24 sps:$4 sm:$0xff]  }
 0x290   :  { %2959 = vmatprep.subr.bf16.mxu0 %v6487_v9  ;;  %4812 = vmatpush1.bf16.msra.mxu1 %v6617_v2  ;;  %v6592_v9 = vld [vmem:[#allocation11 + $0x18c] ss:$24 sps:$4 sm:$0xff]   ;;  %v6590_v2 = vld [vmem:[#allocation11 + $0x188] ss:$24 sps:$4 sm:$0xff]  }
 0x291   :  { %4813 = vmatprep.subr.bf16.mxu1 %v6625_v17  ;;  %v7358_v17 = vld [vmem:[#allocation10] sm:$0x3f] }
 0x293   :  { %2960 = vmatpush1.bf16.msra.mxu0 %v6485_v4  ;;  %v6598_v4 = vld [vmem:[#allocation11 + $0x1bc] ss:$24 sps:$4 sm:$0xff]  }
 0x294   :  { %2961 = vmatprep.subr.bf16.mxu0 %v6490_v37  ;;  %4814 = vmatpush1.bf16.msra.mxu1 %v6623_v18  ;;  %v6596_v37 = vld [vmem:[#allocation11 + $0x1b8] ss:$24 sps:$4 sm:$0xff]   ;;  %v1784_v18 = vrot.slane %v7358_v17, %v7319_v31 }
 0x295   :  { %4815 = vmatprep.subr.bf16.mxu1 %v6631_v20 }
 0x297   :  { %2962 = vmatpush1.bf16.msra.mxu0 %v6488_v5  ;;  %v6604_v5 = vld [vmem:[#allocation11 + $0x1ec] ss:$24 sps:$4 sm:$0xff]  }
 0x298   :  { %2972 = vmatprep.subr.bf16.mxu0 %v6493_v6  ;;  %4816 = vmatpush1.bf16.msra.mxu1 %v6629_v22  ;;  %v6602_v6 = vld [vmem:[#allocation11 + $0x1e8] ss:$24 sps:$4 sm:$0xff]  }
 0x299   :  { %4826 = vmatprep.subr.bf16.mxu1 %v6637_v25 }
 0x29a   :  { %2964 = vmatmul.mubr.bf16.vlgmr.msra.gmra.mrb[8].mxu0 %v7334_v54  ;;  %v6506_v54 = vld [vmem:[#allocation8 + $0x400] ss:$24 sps:$4 sm:$0xff]  }
 0x29b   :  { %2973 = vmatpush1.bf16.msra.mxu0 %v6491_v7  ;;  %3004 = vmatprep.mubr.bf16.mxu0 %v7338_v57  ;;  %v6511_v57 = vld [vmem:[#allocation8 + $0x434] ss:$24 sps:$4 sm:$0xff]   ;;  %v6610_v7 = vld [vmem:[#allocation11 + $0x21c] ss:$24 sps:$4 sm:$0xff]  }
 0x29c   :  { %2974 = vmatprep.subr.bf16.mxu0 %v6496_v8  ;;  %v6608_v8 = vld [vmem:[#allocation11 + $0x218] ss:$24 sps:$4 sm:$0xff]  }
 0x29f   :  { %2975 = vmatpush1.bf16.msra.mxu0 %v6494_v10  ;;  %v6616_v10 = vld [vmem:[#allocation11 + $0x24c] ss:$24 sps:$4 sm:$0xff]  }
 0x2a0   :  { %2976 = vmatprep.subr.bf16.mxu0 %v6499_v11  ;;  %v6614_v11 = vld [vmem:[#allocation11 + $0x248] ss:$24 sps:$4 sm:$0xff]  }
 0x2a3   :  { %2977 = vmatpush1.bf16.msra.mxu0 %v6497_v12  ;;  %v6622_v12 = vld [vmem:[#allocation11 + $0x27c] ss:$24 sps:$4 sm:$0xff]  }
 0x2a4   :  { %2978 = vmatprep.subr.bf16.mxu0 %v6502_v13  ;;  %v6620_v13 = vld [vmem:[#allocation11 + $0x278] ss:$24 sps:$4 sm:$0xff]  }
 0x2a7   :  { %2979 = vmatpush1.bf16.msra.mxu0 %v6500_v14  ;;  %v6628_v14 = vld [vmem:[#allocation11 + $0x2ac] ss:$24 sps:$4 sm:$0xff]  }
 0x2a8   :  { %2980 = vmatprep.subr.bf16.mxu0 %v6505_v15  ;;  %v6626_v15 = vld [vmem:[#allocation11 + $0x2a8] ss:$24 sps:$4 sm:$0xff]  }
 0x2ab   :  { %2981 = vmatpush1.bf16.msra.mxu0 %v6503_v16  ;;  %v6634_v16 = vld [vmem:[#allocation11 + $0x2dc] ss:$24 sps:$4 sm:$0xff]  }
 0x2ac   :  { %2982 = vmatprep.subr.bf16.mxu0 %v6508_v51  ;;  %v6632_v51 = vld [vmem:[#allocation11 + $0x2d8] ss:$24 sps:$4 sm:$0xff]  }
 0x2af   :  { %2983 = vmatpush1.bf16.msra.mxu0 %v6506_v54  ;;  %v6640_v54 = vld [vmem:[#allocation11 + $0x30c] ss:$24 sps:$4 sm:$0xff]  }
 0x2b0   :  { %2984 = vmatprep.subr.bf16.mxu0 %v6511_v57  ;;  %v1780_v57 = vrot.slane %v7358_v17, %v7314_v30 }
 0x2b3   :  { %2985 = vmatpush1.bf16.msra.mxu0 %v6509_v19  ;;  %v1792_v19 = vrot.slane %v7358_v17, %v7322_v32 }
 0x2b4   :  { %2986 = vmatprep.subr.bf16.mxu0 %v6514_v21 }
 0x2b7   :  { %2987 = vmatpush1.bf16.msra.mxu0 %v6512_v23 }
 0x2b8   :  { %2988 = vmatprep.subr.bf16.mxu0 %v6517_v26 }
 0x2bb   :  { %2989 = vmatpush1.bf16.msra.mxu0 %v6515_v27 }
 0x2bc   :  { %2990 = vmatprep.subr.bf16.mxu0 %v6520_v28 }
 0x2bf   :  { %2991 = vmatpush1.bf16.msra.mxu0 %v6518_v29 }
 0x2c0   :  { %2992 = vmatprep.subr.bf16.mxu0 %v6523_v33 }
 0x2c3   :  { %2993 = vmatpush1.bf16.msra.mxu0 %v6521_v34 }
 0x2c4   :  { %2994 = vmatprep.subr.bf16.mxu0 %v6526_v35 }
 0x2c7   :  { %2995 = vmatpush1.bf16.msra.mxu0 %v6524_v36 }
 0x2c8   :  { %2996 = vmatprep.subr.bf16.mxu0 %v6529_v24 }
 0x2cb   :  { %2997 = vmatpush1.bf16.msra.mxu0 %v6527_v38 }
 0x2cc   :  { %2998 = vmatprep.subr.bf16.mxu0 %v6532_v39  ;;  %v6635_v39 = vld [vmem:[#allocation11 + $0x300] ss:$24 sps:$4 sm:$0xff]  }
 0x2cf   :  { %2999 = vmatpush1.bf16.msra.mxu0 %v6530_v40  ;;  %v6638_v40 = vld [vmem:[#allocation11 + $0x308] ss:$24 sps:$4 sm:$0xff]  }
 0x2d0   :  { %3000 = vmatprep.subr.bf16.mxu0 %v6535_v41 }
 0x2d3   :  { %3001 = vmatpush1.bf16.msra.mxu0 %v6533_v42  ;;  %v6643_v42 = vld [vmem:[#allocation11 + $0x334] ss:$24 sps:$4 sm:$0xff]  }
 0x2d4   :  { %3002 = vmatprep.subr.bf16.mxu0 %v6538_v44  ;;  %v6646_v44 = vld [vmem:[#allocation11 + $0x33c] ss:$24 sps:$4 sm:$0xff]  }
 0x2d7   :  { %3003 = vmatpush1.bf16.msra.mxu0 %v6536_v45 }
 0x2d8   :  { %4908 = vmatprep.subr.bf16.mxu0 %v6544_v47  ;;  %v6641_v47 = vld [vmem:[#allocation11 + $0x330] ss:$24 sps:$4 sm:$0xff]  }
 0x2da   :  { %3005 = vmatmul.mubr.bf16.vlgmr.msra.gmra.mrb[8].mxu0 %v7350_v3  ;;  %v6580_v3 = vld [vmem:[#allocation11 + $0x12c] ss:$24 sps:$4 sm:$0xff]  }
 0x2db   :  { %4909 = vmatpush1.bf16.msra.mxu0 %v6542_v48  ;;  %v6644_v48 = vld [vmem:[#allocation11 + $0x338] ss:$24 sps:$4 sm:$0xff]  }
 0x2dc   :  { %4910 = vmatprep.subr.bf16.mxu0 %v6550_v50  ;;  %v6649_v50 = vld [vmem:[#allocation11 + $0x364] ss:$24 sps:$4 sm:$0xff]  }
 0x2df   :  { %4911 = vmatpush1.bf16.msra.mxu0 %v6548_v52  ;;  %v6652_v52 = vld [vmem:[#allocation11 + $0x36c] ss:$24 sps:$4 sm:$0xff]  }
 0x2e0   :  { %4912 = vmatprep.subr.bf16.mxu0 %v6556_v53  ;;  %v6647_v53 = vld [vmem:[#allocation11 + $0x360] ss:$24 sps:$4 sm:$0xff]  }
 0x2e3   :  { %4913 = vmatpush1.bf16.msra.mxu0 %v6554_v55  ;;  %v6650_v55 = vld [vmem:[#allocation11 + $0x368] ss:$24 sps:$4 sm:$0xff]  }
 0x2e4   :  { %4914 = vmatprep.subr.bf16.mxu0 %v6562_v56  ;;  %v6655_v56 = vld [vmem:[#allocation11 + $0x394] ss:$24 sps:$4 sm:$0xff]  }
 0x2e7   :  { %4915 = vmatpush1.bf16.msra.mxu0 %v6560_v58  ;;  %v6658_v58 = vld [vmem:[#allocation11 + $0x39c] ss:$24 sps:$4 sm:$0xff]  }
 0x2e8   :  { %4916 = vmatprep.subr.bf16.mxu0 %v6568_v59  ;;  %v6653_v59 = vld [vmem:[#allocation11 + $0x390] ss:$24 sps:$4 sm:$0xff]  }
 0x2eb   :  { %4917 = vmatpush1.bf16.msra.mxu0 %v6566_v60  ;;  %v6656_v60 = vld [vmem:[#allocation11 + $0x398] ss:$24 sps:$4 sm:$0xff]  }
 0x2ec   :  { %4918 = vmatprep.subr.bf16.mxu0 %v6574_v61  ;;  %v6661_v61 = vld [vmem:[#allocation11 + $0x3c4] ss:$24 sps:$4 sm:$0xff]  }
 0x2ef   :  { %4919 = vmatpush1.bf16.msra.mxu0 %v6572_v62  ;;  %v6664_v62 = vld [vmem:[#allocation11 + $0x3cc] ss:$24 sps:$4 sm:$0xff]  }
 0x2f0   :  { %4920 = vmatprep.subr.bf16.mxu0 %v6580_v3  ;;  %v6659_v3 = vld [vmem:[#allocation11 + $0x3c0] ss:$24 sps:$4 sm:$0xff]  }
 0x2f3   :  { %4921 = vmatpush1.bf16.msra.mxu0 %v6578_v63  ;;  %v6662_v63 = vld [vmem:[#allocation11 + $0x3c8] ss:$24 sps:$4 sm:$0xff]  }
 0x2f4   :  { %4922 = vmatprep.subr.bf16.mxu0 %v6586_v0  ;;  %v6667_v0 = vld [vmem:[#allocation11 + $0x3f4] ss:$24 sps:$4 sm:$0xff]  }
 0x2f7   :  { %4923 = vmatpush1.bf16.msra.mxu0 %v6584_v1  ;;  %v6670_v1 = vld [vmem:[#allocation11 + $0x3fc] ss:$24 sps:$4 sm:$0xff]  }
 0x2f8   :  { %4924 = vmatprep.subr.bf16.mxu0 %v6592_v9  ;;  %v6665_v9 = vld [vmem:[#allocation11 + $0x3f0] ss:$24 sps:$4 sm:$0xff]  }
 0x2fb   :  { %4925 = vmatpush1.bf16.msra.mxu0 %v6590_v2  ;;  %v6668_v2 = vld [vmem:[#allocation11 + $0x3f8] ss:$24 sps:$4 sm:$0xff]  }
 0x2fc   :  { %4926 = vmatprep.subr.bf16.mxu0 %v6598_v4  ;;  %v6673_v4 = vld [vmem:[#allocation11 + $0x424] ss:$24 sps:$4 sm:$0xff]  }
 0x2ff   :  { %4927 = vmatpush1.bf16.msra.mxu0 %v6596_v37  ;;  %v6676_v37 = vld [vmem:[#allocation11 + $0x42c] ss:$24 sps:$4 sm:$0xff]  }
 0x300   :  { %4928 = vmatprep.subr.bf16.mxu0 %v6604_v5  ;;  %v6671_v5 = vld [vmem:[#allocation11 + $0x420] ss:$24 sps:$4 sm:$0xff]  }
 0x303   :  { %4929 = vmatpush1.bf16.msra.mxu0 %v6602_v6  ;;  %v6674_v6 = vld [vmem:[#allocation11 + $0x428] ss:$24 sps:$4 sm:$0xff]  }
 0x304   :  { %4930 = vmatprep.subr.bf16.mxu0 %v6610_v7  ;;  %v6679_v7 = vld [vmem:[#allocation11 + $0x454] ss:$24 sps:$4 sm:$0xff]  }
 0x307   :  { %4931 = vmatpush1.bf16.msra.mxu0 %v6608_v8  ;;  %v6682_v8 = vld [vmem:[#allocation11 + $0x45c] ss:$24 sps:$4 sm:$0xff]  }
 0x308   :  { %4932 = vmatprep.subr.bf16.mxu0 %v6616_v10  ;;  %v6677_v10 = vld [vmem:[#allocation11 + $0x450] ss:$24 sps:$4 sm:$0xff]  }
 0x30b   :  { %4933 = vmatpush1.bf16.msra.mxu0 %v6614_v11  ;;  %v6680_v11 = vld [vmem:[#allocation11 + $0x458] ss:$24 sps:$4 sm:$0xff]  }
 0x30c   :  { %4934 = vmatprep.subr.bf16.mxu0 %v6622_v12  ;;  %v6685_v12 = vld [vmem:[#allocation11 + $0x484] ss:$24 sps:$4 sm:$0xff]  }
 0x30f   :  { %4935 = vmatpush1.bf16.msra.mxu0 %v6620_v13  ;;  %v6688_v13 = vld [vmem:[#allocation11 + $0x48c] ss:$24 sps:$4 sm:$0xff]  }
 0x310   :  { %4936 = vmatprep.subr.bf16.mxu0 %v6628_v14  ;;  %v6683_v14 = vld [vmem:[#allocation11 + $0x480] ss:$24 sps:$4 sm:$0xff]  }
 0x313   :  { %4937 = vmatpush1.bf16.msra.mxu0 %v6626_v15  ;;  %v6686_v15 = vld [vmem:[#allocation11 + $0x488] ss:$24 sps:$4 sm:$0xff]  }
 0x314   :  { %4938 = vmatprep.subr.bf16.mxu0 %v6634_v16  ;;  %v6691_v16 = vld [vmem:[#allocation11 + $0x4b4] ss:$24 sps:$4 sm:$0xff]  }
 0x317   :  { %4939 = vmatpush1.bf16.msra.mxu0 %v6632_v51  ;;  %v6694_v51 = vld [vmem:[#allocation11 + $0x4bc] ss:$24 sps:$4 sm:$0xff]  }
 0x318   :  { %4949 = vmatprep.subr.bf16.mxu0 %v6640_v54  ;;  %v6689_v54 = vld [vmem:[#allocation11 + $0x4b0] ss:$24 sps:$4 sm:$0xff]  }
 0x32d   :  { %v2842_v20 = vpop.f32.mrb[4].mxu0  ;;  %v7366_v21 = vpop.f32.mrb[4].mxu1 }
 0x32e   :  { %v5885_v22 = vadd.f32 %v2842_v20, %v1780_v57  ;;  %v2844_v23 = vpop.f32.mrb[5].mxu0  ;;  %v2926_v25 = vpop.f32.mrb[5].mxu1  ;;  %v6692_v57 = vld [vmem:[#allocation11 + $0x4b8] ss:$24 sps:$4 sm:$0xff]  }
 0x32f   :  { %v5886_v26 = vadd.f32 %v2844_v23, %v1784_v18  ;;  %v5888_v27 = vadd.f32 %v2926_v25, %v1792_v19  ;;  %v2846_v28 = vpop.f32.mrb[6].mxu0  ;;  %v2928_v29 = vpop.f32.mrb[6].mxu1  ;;  %v6697_v18 = vld [vmem:[#allocation11 + $0x4e4] ss:$24 sps:$4 sm:$0xff]   ;;  %v6695_v20 = vld [vmem:[#allocation11 + $0x4e0] ss:$24 sps:$4 sm:$0xff]  }
 0x330   :  { %v3013_v33 = vmax.f32 %v5885_v22, 0.0  ;;  %v2847_v34 = vpop.f32.mrb[7].mxu0  ;;  %v2929_v35 = vpop.f32.mrb[7].mxu1  ;;  %v6700_v19 = vld [vmem:[#allocation11 + $0x4ec] ss:$24 sps:$4 sm:$0xff]  }
 0x331   :  { %v3014_v36 = vmax.f32 %v5886_v26, 0.0  ;;  %v3016_v24 = vmax.f32 %v5888_v27, 0.0  ;;  %v6698_v22 = vld [vmem:[#allocation11 + $0x4e8] ss:$24 sps:$4 sm:$0xff]   ;;  %v6703_v23 = vld [vmem:[#allocation11 + $0x514] ss:$24 sps:$4 sm:$0xff]  }
 0x332   :  { %v7370_v41 = vpack.c.bf16 %v3013_v33, %v3013_v33  ;;  %v6706_v25 = vld [vmem:[#allocation11 + $0x51c] ss:$24 sps:$4 sm:$0xff]   ;;  %v6701_v26 = vld [vmem:[#allocation11 + $0x510] ss:$24 sps:$4 sm:$0xff]   ;;  %v6712_v29 = vld [vmem:[#allocation11 + $0x54c] ss:$24 sps:$4 sm:$0xff]  }
 0x333   :  { %v7368_v38 = vpack.c.bf16 %v3014_v36, %v3014_v36  ;;  %v7374_v45 = vpack.c.bf16 %v3016_v24, %v3016_v24  ;;  %v6704_v27 = vld [vmem:[#allocation11 + $0x518] ss:$24 sps:$4 sm:$0xff]   ;;  %v6709_v28 = vld [vmem:[#allocation11 + $0x544] ss:$24 sps:$4 sm:$0xff]   ;;  %v6710_v34 = vld [vmem:[#allocation11 + $0x548] ss:$24 sps:$4 sm:$0xff]  }
 0x334   :  { %v6707_v33 = vld [vmem:[#allocation11 + $0x540] ss:$24 sps:$4 sm:$0xff]   ;;  %v6715_v35 = vld [vmem:[#allocation11 + $0x574] ss:$24 sps:$4 sm:$0xff]   ;;  %v6713_v24 = vld [vmem:[#allocation11 + $0x570] ss:$24 sps:$4 sm:$0xff]  }
 0x335   :  { %4817 = vmatprep.mubr.bf16.mxu1 %v7368_v38  ;;  %4940 = vmatprep.mubr.bf16.mxu0 %v7368_v38  ;;  %v6718_v36 = vld [vmem:[#allocation11 + $0x57c] ss:$24 sps:$4 sm:$0xff]  }
 0x336   :  { %4818 = vmatmul.mubr.bf16.vlgmr.msra.gmra.mrb[8].mxu1 %v7370_v41  ;;  %4941 = vmatmul.mubr.bf16.vlgmr.msra.gmra.mrb[12].mxu0 %v7370_v41 }
 0x337   :  { %4827 = vmatpush1.bf16.msra.mxu1 %v6635_v39  ;;  %4950 = vmatpush1.bf16.msra.mxu0 %v6638_v40  ;;  %v6716_v39 = vld [vmem:[#allocation11 + $0x578] ss:$24 sps:$4 sm:$0xff]   ;;  %v1788_v40 = vrot.slane %v7358_v17, %v7345_v46 }
 0x338   :  { %4858 = vmatprep.mubr.bf16.mxu1 %v7374_v45  ;;  %4981 = vmatprep.mubr.bf16.mxu0 %v7374_v45 }
 0x339   :  { %4828 = vmatprep.subr.bf16.mxu1 %v6643_v42  ;;  %4951 = vmatprep.subr.bf16.mxu0 %v6646_v44  ;;  %v6721_v42 = vld [vmem:[#allocation11 + $0x5a4] ss:$24 sps:$4 sm:$0xff]  }
 0x33a   :  { %v6724_v44 = vld [vmem:[#allocation11 + $0x5ac] ss:$24 sps:$4 sm:$0xff]  }
 0x33b   :  { %4829 = vmatpush1.bf16.msra.mxu1 %v6641_v47  ;;  %4952 = vmatpush1.bf16.msra.mxu0 %v6644_v48  ;;  %v6719_v47 = vld [vmem:[#allocation11 + $0x5a0] ss:$24 sps:$4 sm:$0xff]  }
 0x33c   :  { %4830 = vmatprep.subr.bf16.mxu1 %v6649_v50  ;;  %4953 = vmatprep.subr.bf16.mxu0 %v6652_v52  ;;  %v6722_v48 = vld [vmem:[#allocation11 + $0x5a8] ss:$24 sps:$4 sm:$0xff]   ;;  %v5887_v50 = vadd.f32 %v7366_v21, %v1788_v40  ;;  %v6727_v52 = vld [vmem:[#allocation11 + $0x5d4] ss:$24 sps:$4 sm:$0xff]  }
 0x33d   :  { %v6739_v21 = vld [vmem:[#allocation11 + $0x634] ss:$24 sps:$4 sm:$0xff]   ;;  %v6791_v40 = vld [vmem:[#allocation11 + $0x7e0] ss:$24 sps:$4 sm:$0xff]  }
 0x33f   :  { %4831 = vmatpush1.bf16.msra.mxu1 %v6647_v53  ;;  %4954 = vmatpush1.bf16.msra.mxu0 %v6650_v55  ;;  %v6730_v53 = vld [vmem:[#allocation11 + $0x5dc] ss:$24 sps:$4 sm:$0xff]   ;;  %v6725_v55 = vld [vmem:[#allocation11 + $0x5d0] ss:$24 sps:$4 sm:$0xff]  }
 0x340   :  { %4832 = vmatprep.subr.bf16.mxu1 %v6655_v56  ;;  %4955 = vmatprep.subr.bf16.mxu0 %v6658_v58  ;;  %v6728_v56 = vld [vmem:[#allocation11 + $0x5d8] ss:$24 sps:$4 sm:$0xff]   ;;  %v3015_v58 = vmax.f32 %v5887_v50, 0.0 }
 0x341   :  { %v6800_v50 = vld [vmem:[#allocation11 + $0x818] ss:$24 sps:$4 sm:$0xff]  }
 0x343   :  { %4833 = vmatpush1.bf16.msra.mxu1 %v6653_v59  ;;  %4956 = vmatpush1.bf16.msra.mxu0 %v6656_v60  ;;  %v6733_v59 = vld [vmem:[#allocation11 + $0x604] ss:$24 sps:$4 sm:$0xff]  }
 0x344   :  { %4834 = vmatprep.subr.bf16.mxu1 %v6661_v61  ;;  %4957 = vmatprep.subr.bf16.mxu0 %v6664_v62  ;;  %v6736_v60 = vld [vmem:[#allocation11 + $0x60c] ss:$24 sps:$4 sm:$0xff]   ;;  %v6731_v61 = vld [vmem:[#allocation11 + $0x600] ss:$24 sps:$4 sm:$0xff]  }
 0x345   :  { %v6734_v62 = vld [vmem:[#allocation11 + $0x608] ss:$24 sps:$4 sm:$0xff]  }
 0x347   :  { %4835 = vmatpush1.bf16.msra.mxu1 %v6659_v3  ;;  %4958 = vmatpush1.bf16.msra.mxu0 %v6662_v63  ;;  %v7383_v3 = vpack.c.bf16 %v3015_v58, %v3015_v58  ;;  %v6742_v63 = vld [vmem:[#allocation11 + $0x63c] ss:$24 sps:$4 sm:$0xff]  }
 0x348   :  { %4836 = vmatprep.subr.bf16.mxu1 %v6667_v0  ;;  %4959 = vmatprep.subr.bf16.mxu0 %v6670_v1  ;;  %v6737_v0 = vld [vmem:[#allocation11 + $0x630] ss:$24 sps:$4 sm:$0xff]   ;;  %v6811_v58 = vld [vmem:[#allocation11 + $0x874] ss:$24 sps:$4 sm:$0xff]  }
 0x349   :  { %v6740_v1 = vld [vmem:[#allocation11 + $0x638] ss:$24 sps:$4 sm:$0xff]  }
 0x34b   :  { %4837 = vmatpush1.bf16.msra.mxu1 %v6665_v9  ;;  %4960 = vmatpush1.bf16.msra.mxu0 %v6668_v2  ;;  %v6745_v9 = vld [vmem:[#allocation11 + $0x664] ss:$24 sps:$4 sm:$0xff]  }
 0x34c   :  { %4838 = vmatprep.subr.bf16.mxu1 %v6673_v4  ;;  %4961 = vmatprep.subr.bf16.mxu0 %v6676_v37  ;;  %v6748_v2 = vld [vmem:[#allocation11 + $0x66c] ss:$24 sps:$4 sm:$0xff]   ;;  %v6743_v4 = vld [vmem:[#allocation11 + $0x660] ss:$24 sps:$4 sm:$0xff]  }
 0x34d   :  { %v6746_v37 = vld [vmem:[#allocation11 + $0x668] ss:$24 sps:$4 sm:$0xff]  }
 0x34f   :  { %4839 = vmatpush1.bf16.msra.mxu1 %v6671_v5  ;;  %4962 = vmatpush1.bf16.msra.mxu0 %v6674_v6  ;;  %v6751_v5 = vld [vmem:[#allocation11 + $0x694] ss:$24 sps:$4 sm:$0xff]  }
 0x350   :  { %4840 = vmatprep.subr.bf16.mxu1 %v6679_v7  ;;  %4963 = vmatprep.subr.bf16.mxu0 %v6682_v8  ;;  %v6754_v6 = vld [vmem:[#allocation11 + $0x69c] ss:$24 sps:$4 sm:$0xff]   ;;  %v6749_v7 = vld [vmem:[#allocation11 + $0x690] ss:$24 sps:$4 sm:$0xff]  }
 0x351   :  { %v6752_v8 = vld [vmem:[#allocation11 + $0x698] ss:$24 sps:$4 sm:$0xff]  }
 0x353   :  { %4841 = vmatpush1.bf16.msra.mxu1 %v6677_v10  ;;  %4964 = vmatpush1.bf16.msra.mxu0 %v6680_v11  ;;  %v6757_v10 = vld [vmem:[#allocation11 + $0x6c4] ss:$24 sps:$4 sm:$0xff]  }
 0x354   :  { %4842 = vmatprep.subr.bf16.mxu1 %v6685_v12  ;;  %4965 = vmatprep.subr.bf16.mxu0 %v6688_v13  ;;  %v6760_v11 = vld [vmem:[#allocation11 + $0x6cc] ss:$24 sps:$4 sm:$0xff]   ;;  %v6755_v12 = vld [vmem:[#allocation11 + $0x6c0] ss:$24 sps:$4 sm:$0xff]  }
 0x355   :  { %v6758_v13 = vld [vmem:[#allocation11 + $0x6c8] ss:$24 sps:$4 sm:$0xff]  }
 0x357   :  { %4843 = vmatpush1.bf16.msra.mxu1 %v6683_v14  ;;  %4966 = vmatpush1.bf16.msra.mxu0 %v6686_v15  ;;  %v6763_v14 = vld [vmem:[#allocation11 + $0x6f4] ss:$24 sps:$4 sm:$0xff]  }
 0x358   :  { %4844 = vmatprep.subr.bf16.mxu1 %v6691_v16  ;;  %4967 = vmatprep.subr.bf16.mxu0 %v6694_v51  ;;  %v6766_v15 = vld [vmem:[#allocation11 + $0x6fc] ss:$24 sps:$4 sm:$0xff]   ;;  %v6761_v16 = vld [vmem:[#allocation11 + $0x6f0] ss:$24 sps:$4 sm:$0xff]  }
 0x359   :  { %v6764_v51 = vld [vmem:[#allocation11 + $0x6f8] ss:$24 sps:$4 sm:$0xff]  }
 0x35b   :  { %4845 = vmatpush1.bf16.msra.mxu1 %v6689_v54  ;;  %4968 = vmatpush1.bf16.msra.mxu0 %v6692_v57  ;;  %v6769_v54 = vld [vmem:[#allocation11 + $0x724] ss:$24 sps:$4 sm:$0xff]  }
 0x35c   :  { %4846 = vmatprep.subr.bf16.mxu1 %v6697_v18  ;;  %4969 = vmatprep.subr.bf16.mxu0 %v6700_v19  ;;  %v6772_v57 = vld [vmem:[#allocation11 + $0x72c] ss:$24 sps:$4 sm:$0xff]   ;;  %v6767_v18 = vld [vmem:[#allocation11 + $0x720] ss:$24 sps:$4 sm:$0xff]  }
 0x35d   :  { %v6770_v19 = vld [vmem:[#allocation11 + $0x728] ss:$24 sps:$4 sm:$0xff]  }
 0x35f   :  { %4847 = vmatpush1.bf16.msra.mxu1 %v6695_v20  ;;  %4970 = vmatpush1.bf16.msra.mxu0 %v6698_v22  ;;  %v6775_v20 = vld [vmem:[#allocation11 + $0x754] ss:$24 sps:$4 sm:$0xff]  }
 0x360   :  { %4848 = vmatprep.subr.bf16.mxu1 %v6703_v23  ;;  %4971 = vmatprep.subr.bf16.mxu0 %v6706_v25  ;;  %v6778_v22 = vld [vmem:[#allocation11 + $0x75c] ss:$24 sps:$4 sm:$0xff]   ;;  %v6773_v23 = vld [vmem:[#allocation11 + $0x750] ss:$24 sps:$4 sm:$0xff]  }
 0x361   :  { %v6776_v25 = vld [vmem:[#allocation11 + $0x758] ss:$24 sps:$4 sm:$0xff]  }
 0x363   :  { %4849 = vmatpush1.bf16.msra.mxu1 %v6701_v26  ;;  %4972 = vmatpush1.bf16.msra.mxu0 %v6704_v27  ;;  %v6781_v26 = vld [vmem:[#allocation11 + $0x784] ss:$24 sps:$4 sm:$0xff]  }
 0x364   :  { %4850 = vmatprep.subr.bf16.mxu1 %v6709_v28  ;;  %4973 = vmatprep.subr.bf16.mxu0 %v6712_v29  ;;  %v6784_v27 = vld [vmem:[#allocation11 + $0x78c] ss:$24 sps:$4 sm:$0xff]   ;;  %v6779_v28 = vld [vmem:[#allocation11 + $0x780] ss:$24 sps:$4 sm:$0xff]  }
 0x365   :  { %v6782_v29 = vld [vmem:[#allocation11 + $0x788] ss:$24 sps:$4 sm:$0xff]  }
 0x367   :  { %4851 = vmatpush1.bf16.msra.mxu1 %v6707_v33  ;;  %4974 = vmatpush1.bf16.msra.mxu0 %v6710_v34  ;;  %v6787_v33 = vld [vmem:[#allocation11 + $0x7b4] ss:$24 sps:$4 sm:$0xff]  }
 0x368   :  { %4852 = vmatprep.subr.bf16.mxu1 %v6715_v35  ;;  %4975 = vmatprep.subr.bf16.mxu0 %v6718_v36  ;;  %v6790_v34 = vld [vmem:[#allocation11 + $0x7bc] ss:$24 sps:$4 sm:$0xff]   ;;  %v6785_v35 = vld [vmem:[#allocation11 + $0x7b0] ss:$24 sps:$4 sm:$0xff]  }
 0x369   :  { %v6788_v36 = vld [vmem:[#allocation11 + $0x7b8] ss:$24 sps:$4 sm:$0xff]  }
 0x36b   :  { %4853 = vmatpush1.bf16.msra.mxu1 %v6713_v24  ;;  %4976 = vmatpush1.bf16.msra.mxu0 %v6716_v39  ;;  %v6793_v24 = vld [vmem:[#allocation11 + $0x7e4] ss:$24 sps:$4 sm:$0xff]  }
 0x36c   :  { %4854 = vmatprep.subr.bf16.mxu1 %v6721_v42  ;;  %4977 = vmatprep.subr.bf16.mxu0 %v6724_v44  ;;  %v6796_v39 = vld [vmem:[#allocation11 + $0x7ec] ss:$24 sps:$4 sm:$0xff]   ;;  %v6794_v42 = vld [vmem:[#allocation11 + $0x7e8] ss:$24 sps:$4 sm:$0xff]  }
 0x36d   :  { %v6799_v44 = vld [vmem:[#allocation11 + $0x814] ss:$24 sps:$4 sm:$0xff]  }
 0x36f   :  { %4855 = vmatpush1.bf16.msra.mxu1 %v6719_v47  ;;  %4978 = vmatpush1.bf16.msra.mxu0 %v6722_v48  ;;  %v6802_v47 = vld [vmem:[#allocation11 + $0x81c] ss:$24 sps:$4 sm:$0xff]   ;;  %v6797_v48 = vld [vmem:[#allocation11 + $0x810] ss:$24 sps:$4 sm:$0xff]  }
 0x370   :  { %4856 = vmatprep.subr.bf16.mxu1 %v6727_v52  ;;  %4979 = vmatprep.subr.bf16.mxu0 %v6730_v53  ;;  %v6805_v52 = vld [vmem:[#allocation11 + $0x844] ss:$24 sps:$4 sm:$0xff]  }
 0x371   :  { %v6808_v53 = vld [vmem:[#allocation11 + $0x84c] ss:$24 sps:$4 sm:$0xff]  }
 0x373   :  { %4857 = vmatpush1.bf16.msra.mxu1 %v6725_v55  ;;  %4980 = vmatpush1.bf16.msra.mxu0 %v6728_v56  ;;  %v6803_v55 = vld [vmem:[#allocation11 + $0x840] ss:$24 sps:$4 sm:$0xff]  }
 0x374   :  { %4867 = vmatprep.subr.bf16.mxu1 %v6733_v59  ;;  %4990 = vmatprep.subr.bf16.mxu0 %v6736_v60  ;;  %v6806_v56 = vld [vmem:[#allocation11 + $0x848] ss:$24 sps:$4 sm:$0xff]   ;;  %v6814_v59 = vld [vmem:[#allocation11 + $0x87c] ss:$24 sps:$4 sm:$0xff]   ;;  %v1795_v60 = vsub.s32 4, %v7294_v43 }
 0x376   :  { %4859 = vmatmul.mubr.bf16.vlgmr.msra.gmra.mrb[8].mxu1 %v7383_v3  ;;  %4982 = vmatmul.mubr.bf16.vlgmr.msra.gmra.mrb[12].mxu0 %v7383_v3 }
 0x377   :  { %4868 = vmatpush1.bf16.msra.mxu1 %v6731_v61  ;;  %4991 = vmatpush1.bf16.msra.mxu0 %v6734_v62  ;;  %v6809_v61 = vld [vmem:[#allocation11 + $0x870] ss:$24 sps:$4 sm:$0xff]  }
 0x378   :  { %4869 = vmatprep.subr.bf16.mxu1 %v6739_v21  ;;  %4992 = vmatprep.subr.bf16.mxu0 %v6742_v63  ;;  %v6812_v62 = vld [vmem:[#allocation11 + $0x878] ss:$24 sps:$4 sm:$0xff]   ;;  %v1799_v21 = vsub.s32 5, %v7294_v43  ;;  %v6817_v63 = vld [vmem:[#allocation11 + $0x8a4] ss:$24 sps:$4 sm:$0xff]  }
 0x37b   :  { %4870 = vmatpush1.bf16.msra.mxu1 %v6737_v0  ;;  %4993 = vmatpush1.bf16.msra.mxu0 %v6740_v1  ;;  %v6820_v0 = vld [vmem:[#allocation11 + $0x8ac] ss:$24 sps:$4 sm:$0xff]   ;;  %v1796_v1 = vrot.slane %v7358_v17, %v1795_v60 }
 0x37c   :  { %4871 = vmatprep.subr.bf16.mxu1 %v6745_v9  ;;  %4994 = vmatprep.subr.bf16.mxu0 %v6748_v2  ;;  %v6815_v9 = vld [vmem:[#allocation11 + $0x8a0] ss:$24 sps:$4 sm:$0xff]   ;;  %v1800_v2 = vrot.slane %v7358_v17, %v1799_v21 }
 0x37f   :  { %4872 = vmatpush1.bf16.msra.mxu1 %v6743_v4  ;;  %4995 = vmatpush1.bf16.msra.mxu0 %v6746_v37  ;;  %v6818_v4 = vld [vmem:[#allocation11 + $0x8a8] ss:$24 sps:$4 sm:$0xff]   ;;  %v6823_v37 = vld [vmem:[#allocation11 + $0x8d4] ss:$24 sps:$4 sm:$0xff]  }
 0x380   :  { %4873 = vmatprep.subr.bf16.mxu1 %v6751_v5  ;;  %4996 = vmatprep.subr.bf16.mxu0 %v6754_v6  ;;  %v6826_v5 = vld [vmem:[#allocation11 + $0x8dc] ss:$24 sps:$4 sm:$0xff]  }
 0x383   :  { %4874 = vmatpush1.bf16.msra.mxu1 %v6749_v7  ;;  %4997 = vmatpush1.bf16.msra.mxu0 %v6752_v8 }
 0x384   :  { %4875 = vmatprep.subr.bf16.mxu1 %v6757_v10  ;;  %4998 = vmatprep.subr.bf16.mxu0 %v6760_v11 }
 0x387   :  { %4876 = vmatpush1.bf16.msra.mxu1 %v6755_v12  ;;  %4999 = vmatpush1.bf16.msra.mxu0 %v6758_v13  ;;  %v6821_v12 = vld [vmem:[#allocation11 + $0x8d0] ss:$24 sps:$4 sm:$0xff]  }
 0x388   :  { %4877 = vmatprep.subr.bf16.mxu1 %v6763_v14  ;;  %5000 = vmatprep.subr.bf16.mxu0 %v6766_v15  ;;  %v6824_v13 = vld [vmem:[#allocation11 + $0x8d8] ss:$24 sps:$4 sm:$0xff]  }
 0x38b   :  { %4878 = vmatpush1.bf16.msra.mxu1 %v6761_v16  ;;  %5001 = vmatpush1.bf16.msra.mxu0 %v6764_v51  ;;  %v6829_v16 = vld [vmem:[#allocation11 + $0x14] ss:$24 sps:$4 sm:$0xff]  }
 0x38c   :  { %4879 = vmatprep.subr.bf16.mxu1 %v6769_v54  ;;  %5002 = vmatprep.subr.bf16.mxu0 %v6772_v57  ;;  %v6827_v54 = vld [vmem:[#allocation11 + $0x10] ss:$24 sps:$4 sm:$0xff]  }
 0x38f   :  { %4880 = vmatpush1.bf16.msra.mxu1 %v6767_v18  ;;  %5003 = vmatpush1.bf16.msra.mxu0 %v6770_v19  ;;  %v6832_v18 = vld [vmem:[#allocation11 + $0x44] ss:$24 sps:$4 sm:$0xff]   ;;  %v6830_v19 = vld [vmem:[#allocation11 + $0x40] ss:$24 sps:$4 sm:$0xff]  }
 0x390   :  { %4881 = vmatprep.subr.bf16.mxu1 %v6775_v20  ;;  %5004 = vmatprep.subr.bf16.mxu0 %v6778_v22  ;;  %v6835_v20 = vld [vmem:[#allocation11 + $0x74] ss:$24 sps:$4 sm:$0xff]   ;;  %v6833_v22 = vld [vmem:[#allocation11 + $0x70] ss:$24 sps:$4 sm:$0xff]  }
 0x393   :  { %4882 = vmatpush1.bf16.msra.mxu1 %v6773_v23  ;;  %5005 = vmatpush1.bf16.msra.mxu0 %v6776_v25  ;;  %v6838_v23 = vld [vmem:[#allocation11 + $0xa4] ss:$24 sps:$4 sm:$0xff]   ;;  %v6836_v25 = vld [vmem:[#allocation11 + $0xa0] ss:$24 sps:$4 sm:$0xff]  }
 0x394   :  { %4883 = vmatprep.subr.bf16.mxu1 %v6781_v26  ;;  %5006 = vmatprep.subr.bf16.mxu0 %v6784_v27  ;;  %v6841_v26 = vld [vmem:[#allocation11 + $0xd4] ss:$24 sps:$4 sm:$0xff]   ;;  %v6839_v27 = vld [vmem:[#allocation11 + $0xd0] ss:$24 sps:$4 sm:$0xff]  }
 0x397   :  { %4884 = vmatpush1.bf16.msra.mxu1 %v6779_v28  ;;  %5007 = vmatpush1.bf16.msra.mxu0 %v6782_v29  ;;  %v6844_v28 = vld [vmem:[#allocation11 + $0x104] ss:$24 sps:$4 sm:$0xff]   ;;  %v6842_v29 = vld [vmem:[#allocation11 + $0x100] ss:$24 sps:$4 sm:$0xff]  }
 0x398   :  { %4885 = vmatprep.subr.bf16.mxu1 %v6787_v33  ;;  %5008 = vmatprep.subr.bf16.mxu0 %v6790_v34  ;;  %v6847_v33 = vld [vmem:[#allocation11 + $0x134] ss:$24 sps:$4 sm:$0xff]   ;;  %v6850_v34 = vld [vmem:[#allocation11 + $0x164] ss:$24 sps:$4 sm:$0xff]  }
 0x39b   :  { %4886 = vmatpush1.bf16.msra.mxu1 %v6785_v35  ;;  %5009 = vmatpush1.bf16.msra.mxu0 %v6788_v36  ;;  %v6848_v35 = vld [vmem:[#allocation11 + $0x160] ss:$24 sps:$4 sm:$0xff]   ;;  %v6853_v36 = vld [vmem:[#allocation11 + $0x194] ss:$24 sps:$4 sm:$0xff]  }
 0x39c   :  { %4887 = vmatprep.subr.bf16.mxu1 %v6793_v24  ;;  %5010 = vmatprep.subr.bf16.mxu0 %v6796_v39  ;;  %v6851_v24 = vld [vmem:[#allocation11 + $0x190] ss:$24 sps:$4 sm:$0xff]   ;;  %v6856_v39 = vld [vmem:[#allocation11 + $0x1c4] ss:$24 sps:$4 sm:$0xff]  }
 0x39f   :  { %4888 = vmatpush1.bf16.msra.mxu1 %v6791_v40  ;;  %5011 = vmatpush1.bf16.msra.mxu0 %v6794_v42  ;;  %v6854_v40 = vld [vmem:[#allocation11 + $0x1c0] ss:$24 sps:$4 sm:$0xff]   ;;  %v6859_v42 = vld [vmem:[#allocation11 + $0x1f4] ss:$24 sps:$4 sm:$0xff]  }
 0x3a0   :  { %4889 = vmatprep.subr.bf16.mxu1 %v6799_v44  ;;  %5012 = vmatprep.subr.bf16.mxu0 %v6802_v47  ;;  %v6857_v44 = vld [vmem:[#allocation11 + $0x1f0] ss:$24 sps:$4 sm:$0xff]   ;;  %v6862_v47 = vld [vmem:[#allocation11 + $0x224] ss:$24 sps:$4 sm:$0xff]  }
 0x3a3   :  { %4890 = vmatpush1.bf16.msra.mxu1 %v6797_v48  ;;  %5013 = vmatpush1.bf16.msra.mxu0 %v6800_v50  ;;  %v6860_v48 = vld [vmem:[#allocation11 + $0x220] ss:$24 sps:$4 sm:$0xff]   ;;  %v6865_v50 = vld [vmem:[#allocation11 + $0x254] ss:$24 sps:$4 sm:$0xff]  }
 0x3a4   :  { %4891 = vmatprep.subr.bf16.mxu1 %v6805_v52  ;;  %5014 = vmatprep.subr.bf16.mxu0 %v6808_v53  ;;  %v6863_v52 = vld [vmem:[#allocation11 + $0x250] ss:$24 sps:$4 sm:$0xff]   ;;  %v6868_v53 = vld [vmem:[#allocation11 + $0x284] ss:$24 sps:$4 sm:$0xff]  }
 0x3a7   :  { %4892 = vmatpush1.bf16.msra.mxu1 %v6803_v55  ;;  %5015 = vmatpush1.bf16.msra.mxu0 %v6806_v56  ;;  %v6866_v55 = vld [vmem:[#allocation11 + $0x280] ss:$24 sps:$4 sm:$0xff]   ;;  %v6871_v56 = vld [vmem:[#allocation11 + $0x2b4] ss:$24 sps:$4 sm:$0xff]  }
 0x3a8   :  { %4893 = vmatprep.subr.bf16.mxu1 %v6811_v58  ;;  %5016 = vmatprep.subr.bf16.mxu0 %v6814_v59  ;;  %v6869_v58 = vld [vmem:[#allocation11 + $0x2b0] ss:$24 sps:$4 sm:$0xff]   ;;  %v6874_v59 = vld [vmem:[#allocation11 + $0x2e4] ss:$24 sps:$4 sm:$0xff]  }
 0x3ab   :  { %4894 = vmatpush1.bf16.msra.mxu1 %v6809_v61  ;;  %5017 = vmatpush1.bf16.msra.mxu0 %v6812_v62  ;;  %v6872_v61 = vld [vmem:[#allocation11 + $0x2e0] ss:$24 sps:$4 sm:$0xff]   ;;  %v6877_v62 = vld [vmem:[#allocation11 + $0x314] ss:$24 sps:$4 sm:$0xff]  }
 0x3ac   :  { %4895 = vmatprep.subr.bf16.mxu1 %v6817_v63  ;;  %5018 = vmatprep.subr.bf16.mxu0 %v6820_v0  ;;  %v6875_v63 = vld [vmem:[#allocation11 + $0x310] ss:$24 sps:$4 sm:$0xff]   ;;  %v6880_v0 = vld [vmem:[#allocation11 + $0x344] ss:$24 sps:$4 sm:$0xff]  }
 0x3ad   :  { %v3006_v6 = vpop.f32.mrb[8].mxu0 }
 0x3ae   :  { %v5889_v7 = vadd.f32 %v3006_v6, %v1796_v1  ;;  %v3008_v8 = vpop.f32.mrb[9].mxu0  ;;  %v6878_v1 = vld [vmem:[#allocation11 + $0x340] ss:$24 sps:$4 sm:$0xff]   ;;  %v6887_v6 = vld [vmem:[#allocation11 + $0x3d0] ss:$24 sps:$4 sm:$0xff]  }
 0x3af   :  { %v5890_v10 = vadd.f32 %v3008_v8, %v1800_v2  ;;  %4896 = vmatpush1.bf16.msra.mxu1 %v6815_v9  ;;  %v3010_v11 = vpop.f32.mrb[10].mxu0  ;;  %5019 = vmatpush1.bf16.msra.mxu0 %v6818_v4  ;;  %v6883_v9 = vld [vmem:[#allocation11 + $0x374] ss:$24 sps:$4 sm:$0xff]   ;;  %v6881_v2 = vld [vmem:[#allocation11 + $0x370] ss:$24 sps:$4 sm:$0xff]  }
 0x3b0   :  { %v3017_v14 = vmax.f32 %v5889_v7, 0.0  ;;  %v3011_v15 = vpop.f32.mrb[11].mxu0  ;;  %4897 = vmatprep.subr.bf16.mxu1 %v6823_v37  ;;  %5020 = vmatprep.subr.bf16.mxu0 %v6826_v5  ;;  %v6886_v4 = vld [vmem:[#allocation11 + $0x3a4] ss:$24 sps:$4 sm:$0xff]   ;;  %v6884_v37 = vld [vmem:[#allocation11 + $0x3a0] ss:$24 sps:$4 sm:$0xff]  }
 0x3b1   :  { %v3018_v17 = vmax.f32 %v5890_v10, 0.0  ;;  %v6889_v5 = vld [vmem:[#allocation11 + $0x3d4] ss:$24 sps:$4 sm:$0xff]   ;;  %v6892_v7 = vld [vmem:[#allocation11 + $0x404] ss:$24 sps:$4 sm:$0xff]  }
 0x3b2   :  { %v7397_v57 = vpack.c.bf16 %v3017_v14, %v3017_v14  ;;  %v6895_v8 = vld [vmem:[#allocation11 + $0x434] ss:$24 sps:$4 sm:$0xff]   ;;  %v6898_v10 = vld [vmem:[#allocation11 + $0x464] ss:$24 sps:$4 sm:$0xff]   ;;  %v6896_v11 = vld [vmem:[#allocation11 + $0x460] ss:$24 sps:$4 sm:$0xff]  }
 0x3b3   :  { %v7395_v51 = vpack.c.bf16 %v3018_v17, %v3018_v17  ;;  %4898 = vmatpush1.bf16.msra.mxu1 %v6821_v12  ;;  %5021 = vmatpush1.bf16.msra.mxu0 %v6824_v13  ;;  %v6901_v12 = vld [vmem:[#allocation11 + $0x494] ss:$24 sps:$4 sm:$0xff]   ;;  %v6899_v13 = vld [vmem:[#allocation11 + $0x490] ss:$24 sps:$4 sm:$0xff]   ;;  %v6904_v14 = vld [vmem:[#allocation11 + $0x4c4] ss:$24 sps:$4 sm:$0xff]  }
 0x3b4   :  { %5031 = vmatprep.subr.bf16.mxu1 %v6829_v16  ;;  %v6902_v15 = vld [vmem:[#allocation11 + $0x4c0] ss:$24 sps:$4 sm:$0xff]   ;;  %v6907_v16 = vld [vmem:[#allocation11 + $0x4f4] ss:$24 sps:$4 sm:$0xff]   ;;  %v6905_v17 = vld [vmem:[#allocation11 + $0x4f0] ss:$24 sps:$4 sm:$0xff]  }
 0x3b5   :  { %4899 = vmatprep.mubr.bf16.mxu1 %v7395_v51  ;;  %5022 = vmatprep.mubr.bf16.mxu0 %v7395_v51 }
 0x3b6   :  { %4900 = vmatmul.mubr.bf16.vlgmr.msra.gmra.mrb[8].mxu1 %v7397_v57  ;;  %5023 = vmatmul.mubr.bf16.vlgmr.msra.gmra.mrb[12].mxu0 %v7397_v57 }
 0x3b7   :  { %5032 = vmatpush1.bf16.msra.mxu1 %v6827_v54  ;;  %5063 = vmatprep.mubr.bf16.mxu1 %v7368_v38  ;;  %v6845_v38 = vld [vmem:[#allocation11 + $0x130] ss:$24 sps:$4 sm:$0xff]   ;;  %v6910_v54 = vld [vmem:[#allocation11 + $0x524] ss:$24 sps:$4 sm:$0xff]  }
 0x3b8   :  { %5033 = vmatprep.subr.bf16.mxu1 %v6832_v18  ;;  %v6908_v18 = vld [vmem:[#allocation11 + $0x520] ss:$24 sps:$4 sm:$0xff]  }
 0x3bb   :  { %5034 = vmatpush1.bf16.msra.mxu1 %v6830_v19  ;;  %v6913_v19 = vld [vmem:[#allocation11 + $0x554] ss:$24 sps:$4 sm:$0xff]  }
 0x3bc   :  { %5035 = vmatprep.subr.bf16.mxu1 %v6835_v20  ;;  %v6911_v20 = vld [vmem:[#allocation11 + $0x550] ss:$24 sps:$4 sm:$0xff]  }
 0x3bf   :  { %5036 = vmatpush1.bf16.msra.mxu1 %v6833_v22  ;;  %v6916_v22 = vld [vmem:[#allocation11 + $0x584] ss:$24 sps:$4 sm:$0xff]  }
 0x3c0   :  { %5037 = vmatprep.subr.bf16.mxu1 %v6838_v23  ;;  %v6914_v23 = vld [vmem:[#allocation11 + $0x580] ss:$24 sps:$4 sm:$0xff]  }
 0x3c3   :  { %5038 = vmatpush1.bf16.msra.mxu1 %v6836_v25  ;;  %v6919_v25 = vld [vmem:[#allocation11 + $0x5b4] ss:$24 sps:$4 sm:$0xff]  }
 0x3c4   :  { %5039 = vmatprep.subr.bf16.mxu1 %v6841_v26  ;;  %v6917_v26 = vld [vmem:[#allocation11 + $0x5b0] ss:$24 sps:$4 sm:$0xff]  }
 0x3c7   :  { %5040 = vmatpush1.bf16.msra.mxu1 %v6839_v27  ;;  %v6922_v27 = vld [vmem:[#allocation11 + $0x5e4] ss:$24 sps:$4 sm:$0xff]  }
 0x3c8   :  { %5041 = vmatprep.subr.bf16.mxu1 %v6844_v28  ;;  %v6920_v28 = vld [vmem:[#allocation11 + $0x5e0] ss:$24 sps:$4 sm:$0xff]  }
 0x3cb   :  { %5042 = vmatpush1.bf16.msra.mxu1 %v6842_v29  ;;  %v6925_v29 = vld [vmem:[#allocation11 + $0x614] ss:$24 sps:$4 sm:$0xff]  }
 0x3cc   :  { %5043 = vmatprep.subr.bf16.mxu1 %v6847_v33  ;;  %v6923_v33 = vld [vmem:[#allocation11 + $0x610] ss:$24 sps:$4 sm:$0xff]  }
 0x3cf   :  { %5044 = vmatpush1.bf16.msra.mxu1 %v6845_v38  ;;  %v6928_v38 = vld [vmem:[#allocation11 + $0x644] ss:$24 sps:$4 sm:$0xff]  }
 0x3d0   :  { %5045 = vmatprep.subr.bf16.mxu1 %v6850_v34  ;;  %v6926_v34 = vld [vmem:[#allocation11 + $0x640] ss:$24 sps:$4 sm:$0xff]  }
 0x3d3   :  { %5046 = vmatpush1.bf16.msra.mxu1 %v6848_v35  ;;  %v6931_v35 = vld [vmem:[#allocation11 + $0x674] ss:$24 sps:$4 sm:$0xff]  }
 0x3d4   :  { %5047 = vmatprep.subr.bf16.mxu1 %v6853_v36  ;;  %v6929_v36 = vld [vmem:[#allocation11 + $0x670] ss:$24 sps:$4 sm:$0xff]  }
 0x3d7   :  { %5048 = vmatpush1.bf16.msra.mxu1 %v6851_v24  ;;  %v6934_v24 = vld [vmem:[#allocation11 + $0x6a4] ss:$24 sps:$4 sm:$0xff]  }
 0x3d8   :  { %5049 = vmatprep.subr.bf16.mxu1 %v6856_v39  ;;  %v6932_v39 = vld [vmem:[#allocation11 + $0x6a0] ss:$24 sps:$4 sm:$0xff]  }
 0x3db   :  { %5050 = vmatpush1.bf16.msra.mxu1 %v6854_v40  ;;  %v6937_v40 = vld [vmem:[#allocation11 + $0x6d4] ss:$24 sps:$4 sm:$0xff]  }
 0x3dc   :  { %5051 = vmatprep.subr.bf16.mxu1 %v6859_v42  ;;  %v6935_v42 = vld [vmem:[#allocation11 + $0x6d0] ss:$24 sps:$4 sm:$0xff]  }
 0x3df   :  { %5052 = vmatpush1.bf16.msra.mxu1 %v6857_v44  ;;  %v6940_v44 = vld [vmem:[#allocation11 + $0x704] ss:$24 sps:$4 sm:$0xff]  }
 0x3e0   :  { %5053 = vmatprep.subr.bf16.mxu1 %v6862_v47  ;;  %v6943_v47 = vld [vmem:[#allocation11 + $0x734] ss:$24 sps:$4 sm:$0xff]  }
 0x3e3   :  { %5054 = vmatpush1.bf16.msra.mxu1 %v6860_v48  ;;  %v6946_v48 = vld [vmem:[#allocation11 + $0x764] ss:$24 sps:$4 sm:$0xff]  }
 0x3e4   :  { %5055 = vmatprep.subr.bf16.mxu1 %v6865_v50  ;;  %v6944_v50 = vld [vmem:[#allocation11 + $0x760] ss:$24 sps:$4 sm:$0xff]  }
 0x3e7   :  { %5056 = vmatpush1.bf16.msra.mxu1 %v6863_v52  ;;  %v6949_v52 = vld [vmem:[#allocation11 + $0x794] ss:$24 sps:$4 sm:$0xff]  }
 0x3e8   :  { %5057 = vmatprep.subr.bf16.mxu1 %v6868_v53  ;;  %v6947_v53 = vld [vmem:[#allocation11 + $0x790] ss:$24 sps:$4 sm:$0xff]  }
 0x3eb   :  { %5058 = vmatpush1.bf16.msra.mxu1 %v6866_v55  ;;  %v6952_v55 = vld [vmem:[#allocation11 + $0x7c4] ss:$24 sps:$4 sm:$0xff]  }
 0x3ec   :  { %5059 = vmatprep.subr.bf16.mxu1 %v6871_v56  ;;  %v6950_v56 = vld [vmem:[#allocation11 + $0x7c0] ss:$24 sps:$4 sm:$0xff]  }
 0x3ef   :  { %5060 = vmatpush1.bf16.msra.mxu1 %v6869_v58  ;;  %v6955_v58 = vld [vmem:[#allocation11 + $0x7f4] ss:$24 sps:$4 sm:$0xff]  }
 0x3f0   :  { %5061 = vmatprep.subr.bf16.mxu1 %v6874_v59  ;;  %v6953_v59 = vld [vmem:[#allocation11 + $0x7f0] ss:$24 sps:$4 sm:$0xff]  }
 0x3f3   :  { %5062 = vmatpush1.bf16.msra.mxu1 %v6872_v61  ;;  %v6958_v61 = vld [vmem:[#allocation11 + $0x824] ss:$24 sps:$4 sm:$0xff]  }
 0x3f4   :  { %5072 = vmatprep.subr.bf16.mxu1 %v6877_v62  ;;  %v6956_v62 = vld [vmem:[#allocation11 + $0x820] ss:$24 sps:$4 sm:$0xff]  }
 0x3f6   :  { %5064 = vmatmul.mubr.bf16.vlgmr.msra.gmra.mrb[12].mxu1 %v7370_v41  ;;  %v6890_v41 = vld [vmem:[#allocation11 + $0x400] ss:$24 sps:$4 sm:$0xff]  }
 0x3f7   :  { %5073 = vmatpush1.bf16.msra.mxu1 %v6875_v63  ;;  %5104 = vmatprep.mubr.bf16.mxu1 %v7374_v45  ;;  %v6893_v45 = vld [vmem:[#allocation11 + $0x430] ss:$24 sps:$4 sm:$0xff]   ;;  %v6961_v63 = vld [vmem:[#allocation11 + $0x854] ss:$24 sps:$4 sm:$0xff]  }
 0x3f8   :  { %5074 = vmatprep.subr.bf16.mxu1 %v6880_v0  ;;  %v6959_v0 = vld [vmem:[#allocation11 + $0x850] ss:$24 sps:$4 sm:$0xff]  }
 0x3fb   :  { %5075 = vmatpush1.bf16.msra.mxu1 %v6878_v1  ;;  %v6964_v1 = vld [vmem:[#allocation11 + $0x884] ss:$24 sps:$4 sm:$0xff]  }
 0x3fc   :  { %5076 = vmatprep.subr.bf16.mxu1 %v6883_v9  ;;  %v6962_v9 = vld [vmem:[#allocation11 + $0x880] ss:$24 sps:$4 sm:$0xff]  }
 0x3ff   :  { %5077 = vmatpush1.bf16.msra.mxu1 %v6881_v2  ;;  %v6967_v2 = vld [vmem:[#allocation11 + $0x8b4] ss:$24 sps:$4 sm:$0xff]  }
 0x400   :  { %5078 = vmatprep.subr.bf16.mxu1 %v6886_v4  ;;  %v6965_v4 = vld [vmem:[#allocation11 + $0x8b0] ss:$24 sps:$4 sm:$0xff]  }
 0x403   :  { %5079 = vmatpush1.bf16.msra.mxu1 %v6884_v37  ;;  %v6970_v37 = vld [vmem:[#allocation11 + $0x8e4] ss:$24 sps:$4 sm:$0xff]  }
 0x404   :  { %5080 = vmatprep.subr.bf16.mxu1 %v6889_v5  ;;  %v6968_v5 = vld [vmem:[#allocation11 + $0x8e0] ss:$24 sps:$4 sm:$0xff]  }
 0x407   :  { %5081 = vmatpush1.bf16.msra.mxu1 %v6887_v6  ;;  %v3313_v6 = vld [vmem:[#allocation13] sm:$0x3f] }
 0x408   :  { %5082 = vmatprep.subr.bf16.mxu1 %v6892_v7  ;;  %v3318_v7 = vrot.slane %v3313_v6, %v7314_v30 }
 0x40b   :  { %5083 = vmatpush1.bf16.msra.mxu1 %v6890_v41  ;;  %v3326_v41 = vrot.slane %v3313_v6, %v7345_v46 }
 0x40c   :  { %5084 = vmatprep.subr.bf16.mxu1 %v6895_v8  ;;  %v3322_v8 = vrot.slane %v3313_v6, %v7319_v31 }
 0x40f   :  { %5085 = vmatpush1.bf16.msra.mxu1 %v6893_v45  ;;  %v3330_v45 = vrot.slane %v3313_v6, %v7322_v32  ;;  %v3334_v32 = vrot.slane %v3313_v6, %v1795_v60 }
 0x410   :  { %5086 = vmatprep.subr.bf16.mxu1 %v6898_v10 }
 0x413   :  { %5087 = vmatpush1.bf16.msra.mxu1 %v6896_v11 }
 0x414   :  { %5088 = vmatprep.subr.bf16.mxu1 %v6901_v12 }
 0x417   :  { %5089 = vmatpush1.bf16.msra.mxu1 %v6899_v13 }
 0x418   :  { %5090 = vmatprep.subr.bf16.mxu1 %v6904_v14 }
 0x41b   :  { %5091 = vmatpush1.bf16.msra.mxu1 %v6902_v15 }
 0x41c   :  { %5092 = vmatprep.subr.bf16.mxu1 %v6907_v16 }
 0x41f   :  { %5093 = vmatpush1.bf16.msra.mxu1 %v6905_v17 }
 0x420   :  { %5094 = vmatprep.subr.bf16.mxu1 %v6910_v54 }
 0x423   :  { %5095 = vmatpush1.bf16.msra.mxu1 %v6908_v18 }
 0x424   :  { %5096 = vmatprep.subr.bf16.mxu1 %v6913_v19 }
 0x427   :  { %5097 = vmatpush1.bf16.msra.mxu1 %v6911_v20 }
 0x428   :  { %5098 = vmatprep.subr.bf16.mxu1 %v6916_v22 }
 0x42b   :  { %5099 = vmatpush1.bf16.msra.mxu1 %v6914_v23  ;;  %v3338_v23 = vrot.slane %v3313_v6, %v1799_v21 }
 0x42c   :  { %5100 = vmatprep.subr.bf16.mxu1 %v6919_v25 }
 0x42f   :  { %5101 = vmatpush1.bf16.msra.mxu1 %v6917_v26 }
 0x430   :  { %5102 = vmatprep.subr.bf16.mxu1 %v6922_v27 }
 0x433   :  { %5103 = vmatpush1.bf16.msra.mxu1 %v6920_v28 }
 0x434   :  { %5113 = vmatprep.subr.bf16.mxu1 %v6925_v29 }
 0x436   :  { %5105 = vmatmul.mubr.bf16.vlgmr.msra.gmra.mrb[12].mxu1 %v7383_v3  ;;  %v6938_v3 = vld [vmem:[#allocation11 + $0x700] ss:$24 sps:$4 sm:$0xff]  }
 0x437   :  { %5114 = vmatpush1.bf16.msra.mxu1 %v6923_v33  ;;  %5145 = vmatprep.mubr.bf16.mxu1 %v7395_v51  ;;  %v6941_v51 = vld [vmem:[#allocation11 + $0x730] ss:$24 sps:$4 sm:$0xff]  }
 0x438   :  { %5115 = vmatprep.subr.bf16.mxu1 %v6928_v38 }
 0x43b   :  { %5116 = vmatpush1.bf16.msra.mxu1 %v6926_v34 }
 0x43c   :  { %5117 = vmatprep.subr.bf16.mxu1 %v6931_v35 }
 0x43f   :  { %5118 = vmatpush1.bf16.msra.mxu1 %v6929_v36 }
 0x440   :  { %5119 = vmatprep.subr.bf16.mxu1 %v6934_v24 }
 0x443   :  { %5120 = vmatpush1.bf16.msra.mxu1 %v6932_v39 }
 0x444   :  { %5121 = vmatprep.subr.bf16.mxu1 %v6937_v40 }
 0x447   :  { %5122 = vmatpush1.bf16.msra.mxu1 %v6935_v42 }
 0x448   :  { %5123 = vmatprep.subr.bf16.mxu1 %v6940_v44 }
 0x44b   :  { %5124 = vmatpush1.bf16.msra.mxu1 %v6938_v3 }
 0x44c   :  { %5125 = vmatprep.subr.bf16.mxu1 %v6943_v47 }
 0x44f   :  { %5126 = vmatpush1.bf16.msra.mxu1 %v6941_v51 }
 0x450   :  { %5127 = vmatprep.subr.bf16.mxu1 %v6946_v48 }
 0x453   :  { %5128 = vmatpush1.bf16.msra.mxu1 %v6944_v50 }
 0x454   :  { %5129 = vmatprep.subr.bf16.mxu1 %v6949_v52 }
 0x457   :  { %5130 = vmatpush1.bf16.msra.mxu1 %v6947_v53 }
 0x458   :  { %5131 = vmatprep.subr.bf16.mxu1 %v6952_v55 }
 0x45b   :  { %5132 = vmatpush1.bf16.msra.mxu1 %v6950_v56 }
 0x45c   :  { %5133 = vmatprep.subr.bf16.mxu1 %v6955_v58 }
 0x45f   :  { %5134 = vmatpush1.bf16.msra.mxu1 %v6953_v59 }
 0x460   :  { %5135 = vmatprep.subr.bf16.mxu1 %v6958_v61 }
 0x463   :  { %5136 = vmatpush1.bf16.msra.mxu1 %v6956_v62 }
 0x464   :  { %5137 = vmatprep.subr.bf16.mxu1 %v6961_v63 }
 0x467   :  { %5138 = vmatpush1.bf16.msra.mxu1 %v6959_v0 }
 0x468   :  { %5139 = vmatprep.subr.bf16.mxu1 %v6964_v1 }
 0x46b   :  { %5140 = vmatpush1.bf16.msra.mxu1 %v6962_v9 }
 0x46c   :  { %5141 = vmatprep.subr.bf16.mxu1 %v6967_v2 }
 0x46f   :  { %5142 = vmatpush1.bf16.msra.mxu1 %v6965_v4 }
 0x470   :  { %5143 = vmatprep.subr.bf16.mxu1 %v6970_v37 }
 0x473   :  { %5144 = vmatpush1.bf16.msra.mxu1 %v6968_v5 }
 0x476   :  { %5146 = vmatmul.mubr.bf16.vlgmr.msra.gmra.mrb[12].mxu1 %v7397_v57 }
 0x489   :  { %v4901_v10 = vpop.f32.mrb[8].mxu1  ;;  %v5024_v11 = vpop.f32.mrb[12].mxu0 }
 0x48a   :  { %v5891_v12 = vadd.f32 %v4901_v10, %v3318_v7  ;;  %v5893_v13 = vadd.f32 %v5024_v11, %v3326_v41  ;;  %v4903_v14 = vpop.f32.mrb[9].mxu1  ;;  %v5026_v15 = vpop.f32.mrb[13].mxu0 }
 0x48b   :  { %v5892_v16 = vadd.f32 %v4903_v14, %v3322_v8  ;;  %v5894_v17 = vadd.f32 %v5026_v15, %v3330_v45  ;;  %v4905_v54 = vpop.f32.mrb[10].mxu1  ;;  %v5028_v18 = vpop.f32.mrb[14].mxu0 }
 0x48c   :  { %v4906_v57 = vpop.f32.mrb[11].mxu1  ;;  %v5029_v19 = vpop.f32.mrb[15].mxu0 }
 0x48d   :  { %v5160_v20 = vcombine.low %v5891_v12, %v5892_v16  ;;  %v5161_v30 = vcombine.low %v5893_v13, %v5894_v17 }
 0x48f   :  { %v5168_v46 = vrot.slane %v5160_v20, %v7297_v49  ;;  %v5175_v31 = vrot.slane %v5161_v30, %v7297_v49 }
 0x491   :  { %v5176_v22 = vcombine.low %v5168_v46, %v5175_v31 }
 0x493   :  { %5187 = vst [vmem:[#allocation14] sm:$0xff] %v5176_v22 }
 0x549   :  { %v5147_v25 = vpop.f32.mrb[12].mxu1 }
 0x54a   :  { %v5895_v26 = vadd.f32 %v5147_v25, %v3334_v32  ;;  %v5149_v27 = vpop.f32.mrb[13].mxu1 }
 0x54b   :  { %v5896_v28 = vadd.f32 %v5149_v27, %v3338_v23  ;;  %v5151_v29 = vpop.f32.mrb[14].mxu1 }
 0x54c   :  { %v5152_v33 = vpop.f32.mrb[15].mxu1 }
 0x54d   :  { %v5177_v38 = vcombine.low %v5895_v26, %v5896_v28 }
 0x54f   :  { %5880 = vst.sshfl [vmem:[#allocation14 + $0x8] sm:$0x33 pattern:$0x76325410] %v5177_v38 }
 0x550   :  { %7136 = shalt.err (!%p7133_p4)
}
 0x551   :  { %s7137_s0 = scalar_lea.hbm %s7438_s7, 192 }
 0x552   :  { %p7138_p5 = scmp.ne.s32.totalorder %s7438_s7, %s7137_s0  ;;  %p7141_p6 = scmp.lt.u32.totalorder %s7137_s0, %s7438_s7 }
 0x554   :  { %p7143_p7 = pnand %p7141_p6, %p7138_p5 }
 0x556   :  { %7146 = shalt.err (!%p7143_p7)
}
 0x557   :  { %5198 = dma.vmem_to_hbm [thread:$0]  %s5196_s11, 192, %s7438_s7, [#allocation4]  }
 0x558   :  { %7155 = dma.done.wait [#allocation4], 192  }
 0x559   :  { %7156 = vsyncadd [#allocation4], 4294967104 }
 0x55a   :  { %5202 = vsyncpa [#allocation3], 1 }
 0x55b   :  { %5203 = vsyncpa [#allocation6], 1 }
 0x55c   :  { %5204 = vsyncpa [#allocation9], 1 }
 0x55d   :  { %5205 = vsyncpa [#allocation12], 1 }
 0x55e   :  { %5206 = vsyncpa [#allocation4], 1 }

</bundles_post_ra>
